<compile_context>
chip_gen: v6e
topology: v6e:2x2x1
jax: 0.10.0
libtpu: 0.0.40
codegen_flags: <defaults>
</compile_context>

<pallas_src>
import jax
import jax.numpy as jnp
from jax import lax
from jax.experimental import pallas as pl
from jax.experimental.pallas import tpu as pltpu

BN_EPS = 1e-5
LANES = 128


def _round_up(n, m):
    return ((n + m - 1) // m) * m


# ----------------------------------------------------------------------------
# Static dimension / slab-layout bookkeeping (shared by prep and kernel)
# ----------------------------------------------------------------------------
def _dims(N, C, H, W, Hy, Wy):
    CH = C // 2                        # hidden channels of the 3x3 convs
    CHp = _round_up(max(CH, 1), 8)     # padded hidden rows (sublane aligned)
    Cp = _round_up(C, 8)               # padded output / attention channels
    HW, HWy = H * W, Hy * Wy
    R1 = 2 * CHp                       # conv1 stacked rows: [sh1 hid | att hid]
    R2 = CHp + Cp                      # conv2 stacked rows: [sh1 hid2 | att hid2]
    R3 = 2 * Cp                        # conv3 stacked rows: [x1 | att logits]
    w_rows = (R1, R2, R3, CHp, CHp, Cp)
    w_off, r = [], 0
    for n_ in w_rows:
        w_off.append(r)
        r += n_
    b_rows = (R1, R2, CHp, CHp)
    b_off, r = [], 0
    for n_ in b_rows:
        b_off.append(r)
        r += n_
    return dict(N=N, C=C, CH=CH, CHp=CHp, Cp=Cp, H=H, W=W, Hy=Hy, Wy=Wy,
                HW=HW, HWy=HWy,
                Lhi=_round_up(N * HW, LANES), Llo=_round_up(N * HWy, LANES),
                R1=R1, R2=R2, R3=R3,
                w_off=tuple(w_off), b_off=tuple(b_off))


# ----------------------------------------------------------------------------
# Fused forward kernel (whole network, one grid-less pallas_call invocation)
# ----------------------------------------------------------------------------
def _make_kernel(d):
    N, C = d["N"], d["C"]
    CHp, Cp = d["CHp"], d["Cp"]
    W, Wy = d["W"], d["Wy"]
    HW, HWy = d["HW"], d["HWy"]
    R1, R2, R3 = d["R1"], d["R2"], d["R3"]
    o1, o2, o3, o4, o5, o6 = d["w_off"]
    c1, c2, c3, c4 = d["b_off"]

    def rot_left(x, k):
        """out[:, l] = x[:, (l + k) % L] -- cyclic lane rotation, static k."""
        if k == 0:
            return x
        return jnp.concatenate([x[:, k:], x[:, :k]], axis=1)

    def im2col(x, masks, w_img):
        """3x3/pad=1 im2col on a lane-flattened (rows, L) image batch.

        `masks` is the precomputed (9, L) 0/1 boundary-mask table (it also
        zeroes cross-image bleed, wraparound and any padded lanes).  Returns
        the (9*rows, L) patch in bf16, built entirely in registers/values.
        """
        rows, L = x.shape
        taps = []
        t = 0
        for dy in (-1, 0, 1):
            for dx in (-1, 0, 1):
                s = (dy * w_img + dx) % L
                tap = rot_left(x, s) * masks[t:t + 1, :]
                taps.append(tap.astype(jnp.bfloat16))
                t += 1
        return jnp.concatenate(taps, axis=0)

    def mm(w, v):
        # bf16 x bf16 MXU matmul with f32 accumulation.
        return jnp.dot(w, v.astype(jnp.bfloat16),
                       preferred_element_type=jnp.float32)

    def kernel(x_ref, y_ref, up_ref, mh_ref, ml_ref, w_ref, b_ref, o_ref):
        mh = mh_ref[...]                       # (9, Lhi) tap masks, hi-res
        ml = ml_ref[...]                       # (9, Llo) tap masks, lo-res

        # ---- hi-res: Semantic_Head1 + attention gate, branch-fused --------
        px = im2col(x_ref[...], mh, W)                       # (9C, Lhi)
        h = jnp.maximum(mm(w_ref[o1:o1 + R1, 0:9 * C], px)
                        + b_ref[c1:c1 + R1, :], 0.0)         # (R1, Lhi)
        ph = im2col(h, mh, W)                                 # (9*R1, Lhi)
        h2 = jnp.maximum(mm(w_ref[o2:o2 + R2, 0:9 * R1], ph)
                         + b_ref[c2:c2 + R2, :], 0.0)        # (R2, Lhi)
        z = mm(w_ref[o3:o3 + R3, 0:R2], h2)                  # (R3, Lhi)
        x1 = z[0:C, :]                                       # Semantic_Head1(x)
        a = jax.nn.sigmoid(z[Cp:Cp + C, :])                  # attention map

        # ---- lo-res: Semantic_Head2(y) -------------------------------------
        py = im2col(y_ref[...], ml, Wy)                      # (9C, Llo)
        g = jnp.maximum(mm(w_ref[o4:o4 + CHp, 0:9 * C], py)
                        + b_ref[c3:c3 + CHp, :], 0.0)        # (CHp, Llo)
        pg = im2col(g, ml, Wy)                               # (9*CHp, Llo)
        g2 = jnp.maximum(mm(w_ref[o5:o5 + CHp, 0:9 * CHp], pg)
                         + b_ref[c4:c4 + CHp, :], 0.0)       # (CHp, Llo)
        y1_lo = mm(w_ref[o6:o6 + C, 0:CHp], g2)              # (C, Llo)

        # ---- bilinear (align_corners=True) upsample, per image ------------
        ups = []
        for n in range(N):
            yn = y1_lo[:, n * HWy:(n + 1) * HWy].astype(jnp.bfloat16)
            ups.append(jnp.dot(yn, up_ref[...],
                               preferred_element_type=jnp.float32))
        y1 = jnp.concatenate(ups, axis=1)                    # (C, N*HW)
        if y1.shape[1] < x1.shape[1]:                        # general lane pad
            y1 = jnp.pad(y1, ((0, 0), (0, x1.shape[1] - y1.shape[1])))

        # out = Head1(x) * a + up(Head2(y)) * (1 - a)
        # (any padded lanes beyond N*H*W are garbage and sliced off in the
        #  wrapper; here N*H*W is already a multiple of 128 so none exist)
        o_ref[...] = x1 * a + y1 * (1.0 - a)

    return kernel


# ----------------------------------------------------------------------------
# Parameter preparation: fold BN, pad channels, fuse branches, pack slabs
# ----------------------------------------------------------------------------
def _fold_bn(w, bn):
    gamma, beta, mean, var = bn
    scale = gamma / jnp.sqrt(var + BN_EPS)
    return w * scale[:, None], beta - mean * scale


def _embed_conv3x3(w, in_off, in_total):
    """Re-index a (cout, 9*cin) conv weight so its input channels sit at
    offset `in_off` inside a stacked input of `in_total` channels."""
    cout, n9 = w.shape
    cin = n9 // 9
    out = jnp.zeros((cout, 9, in_total), w.dtype)
    out = out.at[:, :, in_off:in_off + cin].set(w.reshape(cout, 9, cin))
    return out.reshape(cout, 9 * in_total)


def _pad_rows(w, rows):
    return jnp.pad(w, ((0, rows - w.shape[0]), (0, 0)))


def _pad_cols(w, cols):
    return jnp.pad(w, ((0, 0), (0, cols - w.shape[1])))


def bilinear_matrix(out_size, in_size):
    """1D bilinear interpolation matrix (out, in), align_corners=True."""
    if out_size == 1:
        src = jnp.zeros((1,), jnp.float32)
    else:
        src = (jnp.arange(out_size, dtype=jnp.float32)
               * (in_size - 1) / (out_size - 1))
    lo = jnp.clip(jnp.floor(src).astype(jnp.int32), 0, in_size - 1)
    hi = jnp.clip(lo + 1, 0, in_size - 1)
    frac = src - lo.astype(jnp.float32)
    rows = jnp.arange(out_size)
    A = jnp.zeros((out_size, in_size), jnp.float32)
    A = A.at[rows, lo].add(1.0 - frac)
    A = A.at[rows, hi].add(frac)
    return A


def _tap_masks(N, Himg, Wimg, L):
    """(9, L) 0/1 masks: tap (dy,dx) is valid at lane l iff the shifted pixel
    stays inside the same image; padded lanes (>= N*H*W) are always 0."""
    lane = jnp.arange(L)
    p = lane % (Himg * Wimg)
    valid = lane < N * Himg * Wimg
    row, col = p // Wimg, p % Wimg
    masks = []
    for dy in (-1, 0, 1):
        for dx in (-1, 0, 1):
            ok = (valid & (row + dy >= 0) & (row + dy < Himg)
                  & (col + dx >= 0) & (col + dx < Wimg))
            masks.append(ok)
    return jnp.stack(masks).astype(jnp.float32)


def prepare_branch_attention(params, N, C, H, W, Hy, Wy):
    """Fold BN into conv weights, pad/stack/block-diagonalise them, pack the
    bf16 weight slab + f32 bias slab, and precompute masks + the bilinear
    Kron matrix.  Call once, outside jit."""
    d = _dims(N, C, H, W, Hy, Wy)
    CH, CHp, Cp = d["CH"], d["CHp"], d["Cp"]
    R1, R2 = d["R1"], d["R2"]

    def fold_head(head):
        w1, bn1, w2, bn2, w3 = head
        w1f, b1 = _fold_bn(w1, bn1)
        w2f, b2 = _fold_bn(w2, bn2)
        return w1f, b1, w2f, b2, w3

    s1w1, s1b1, s1w2, s1b2, s1w3 = fold_head(params["sh1"])
    s2w1, s2b1, s2w2, s2b2, s2w3 = fold_head(params["sh2"])
    aw1, ab1, aw2, ab2, aw3 = fold_head(params["att"])

    # hi-res, branch-fused: [Semantic_Head1 | attention gate]
    W1s = jnp.concatenate([_pad_rows(s1w1, CHp), _pad_rows(aw1, CHp)], 0)
    b1s = jnp.concatenate([jnp.pad(s1b1, (0, CHp - CH)),
                           jnp.pad(ab1, (0, CHp - CH))])
    W2s = jnp.concatenate(
        [_pad_rows(_embed_conv3x3(s1w2, 0, R1), CHp),
         _pad_rows(_embed_conv3x3(aw2, CHp, R1), Cp)], 0)
    b2s = jnp.concatenate([jnp.pad(s1b2, (0, CHp - CH)),
                           jnp.pad(ab2, (0, Cp - C))])
    W3s = jnp.concatenate(
        [_pad_rows(_pad_cols(s1w3, R2), Cp),
         _pad_rows(jnp.pad(aw3, ((0, 0), (CHp, R2 - CHp - aw3.shape[1]))), Cp)],
        0)

    # lo-res Semantic_Head2
    W1lo = _pad_rows(s2w1, CHp)
    b1lo = jnp.pad(s2b1, (0, CHp - CH))
    W2lo = _pad_rows(_embed_conv3x3(s2w2, 0, CHp), CHp)
    b2lo = jnp.pad(s2b2, (0, CHp - CH))
    W3lo = _pad_rows(_pad_cols(s2w3, CHp), Cp)

    blocks = [W1s, W2s, W3s, W1lo, W2lo, W3lo]
    assert all(off % 8 == 0 for off in d["w_off"])
    wcols = max(b.shape[1] for b in blocks)
    wslab = jnp.concatenate([_pad_cols(b, wcols) for b in blocks],
                            axis=0).astype(jnp.bfloat16)
    bslab = jnp.concatenate([b1s, b2s, b1lo, b2lo]).reshape(-1, 1)
    bslab = bslab.astype(jnp.float32)

    masks_hi = _tap_masks(N, H, W, d["Lhi"])
    masks_lo = _tap_masks(N, Hy, Wy, d["Llo"])
    up = jnp.kron(bilinear_matrix(H, Hy),
                  bilinear_matrix(W, Wy)).T.astype(jnp.bfloat16)   # (HWy, HW)

    return dict(wslab=wslab, bslab=bslab,
                masks_hi=masks_hi, masks_lo=masks_lo, up=up)


# ----------------------------------------------------------------------------
# Wrapper
# ----------------------------------------------------------------------------
def branch_attention_forward(x_nchw, y_nchw, prep):
    """x: (N, C, H, W), y: (N, C, Hy, Wy) NCHW.  Returns NCHW output."""
    N, C, H, W = x_nchw.shape
    Hy, Wy = y_nchw.shape[2], y_nchw.shape[3]
    d = _dims(N, C, H, W, Hy, Wy)
    HW, HWy, Lhi, Llo = d["HW"], d["HWy"], d["Lhi"], d["Llo"]

    def to_lane_slab(a, hw_img, L):
        # (N, C, h, w) -> (C, N*h*w): channels in sublanes, images laid
        # side-by-side (contiguously) in the lane axis.  Pad lanes only if
        # N*h*w is not already a multiple of 128 (here it is: no pad).
        flat = (a.astype(jnp.float32).reshape(N, C, hw_img)
                .transpose(1, 0, 2).reshape(C, N * hw_img))
        if L > N * hw_img:
            flat = jnp.pad(flat, ((0, 0), (0, L - N * hw_img)))
        return flat

    x2 = to_lane_slab(x_nchw, HW, Lhi)
    y2 = to_lane_slab(y_nchw, HWy, Llo)

    vmem_spec = lambda: pl.BlockSpec(memory_space=pltpu.MemorySpace.VMEM)
    out = pl.pallas_call(
        _make_kernel(d),
        out_shape=jax.ShapeDtypeStruct((C, Lhi), jnp.float32),
        # No grid: the whole problem fits in VMEM after folding the batch
        # into the lane axis, so every array is a single full-size block.
        in_specs=[vmem_spec() for _ in range(7)],
        out_specs=vmem_spec(),
    )(x2, y2, prep["up"], prep["masks_hi"], prep["masks_lo"],
      prep["wslab"], prep["bslab"])

    return out[:, :N * HW].reshape(C, N, H, W).transpose(1, 0, 2, 3)


# ----------------------------------------------------------------------------
# Parameters (deterministic, synthetic; BN with non-trivial running stats)
# ----------------------------------------------------------------------------
def _kaiming3x3(key, cout, cin):
    fan_out = 9 * cout
    w = jax.random.normal(key, (cout, 3, 3, cin), jnp.float32)
    return ((2.0 / fan_out) ** 0.5 * w).reshape(cout, 9 * cin)


def _kaiming1x1(key, cout, cin):
    return ((2.0 / cout) ** 0.5
            * jax.random.normal(key, (cout, cin), jnp.float32))


def _random_bn(key, c):
    k1, k2, k3, k4 = jax.random.split(key, 4)
    gamma = 0.5 + jax.random.uniform(k1, (c,), jnp.float32)
    beta = 0.1 * jax.random.normal(k2, (c,), jnp.float32)
    mean = 0.1 * jax.random.normal(k3, (c,), jnp.float32)
    var = 0.5 + jax.random.uniform(k4, (c,), jnp.float32)
    return gamma, beta, mean, var


def make_head_params(key, cin, cm1, cm2, cout):
    """conv3x3(cin->cm1)+BN+ReLU, conv3x3(cm1->cm2)+BN+ReLU, conv1x1(cm2->cout)."""
    k1, k2, k3, k4, k5 = jax.random.split(key, 5)
    return (_kaiming3x3(k1, cm1, cin), _random_bn(k2, cm1),
            _kaiming3x3(k3, cm2, cm1), _random_bn(k4, cm2),
            _kaiming1x1(k5, cout, cm2))


# ----------------------------------------------------------------------------
# Pure-JAX reference (correctness check)
# ----------------------------------------------------------------------------
def _ref_conv3x3_bn_relu(x, w9, bn):
    cout, cin = w9.shape[0], w9.shape[1] // 9
    w = w9.reshape(cout, 3, 3, cin).transpose(0, 3, 1, 2)     # OIHW
    z = lax.conv_general_dilated(
        x, w, window_strides=(1, 1), padding="SAME",
        dimension_numbers=("NCHW", "OIHW", "NCHW"),
        precision=lax.Precision.HIGHEST)
    gamma, beta, mean, var = bn
    scale = gamma / jnp.sqrt(var + BN_EPS)
    z = (z * scale.reshape(1, -1, 1, 1)
         + (beta - mean * scale).reshape(1, -1, 1, 1))
    return jnp.maximum(z, 0.0)


def _ref_head(x, head, sigmoid=False):
    w1, bn1, w2, bn2, w3 = head
    h = _ref_conv3x3_bn_relu(x, w1, bn1)
    h = _ref_conv3x3_bn_relu(h, w2, bn2)
    z = jnp.einsum("oc,nchw->nohw", w3, h, precision=lax.Precision.HIGHEST)
    return jax.nn.sigmoid(z) if sigmoid else z


def branch_attention_reference(x, y, params):
    H, W = x.shape[2], x.shape[3]
    Hy, Wy = y.shape[2], y.shape[3]
    x1 = _ref_head(x, params["sh1"])
    y1 = _ref_head(y, params["sh2"])
    a = _ref_head(x, params["att"], sigmoid=True)
    Ah = bilinear_matrix(H, Hy)
    Aw = bilinear_matrix(W, Wy)
    y1_up = jnp.einsum("hH,wW,ncHW->nchw", Ah, Aw, y1,
                       precision=lax.Precision.HIGHEST)
    return x1 * a + y1_up * (1.0 - a)


# ----------------------------------------------------------------------------
if __name__ == "__main__":
    key = jax.random.PRNGKey(0)
    N, C, H, W = 2, 8, 16, 16
    Hy, Wy = 8, 8

    kx, ky, k1, k2, k3 = jax.random.split(key, 5)
    x = jax.random.normal(kx, (N, C, H, W), jnp.float32)     # PyTorch NCHW
    y = jax.random.normal(ky, (N, C, Hy, Wy), jnp.float32)   # PyTorch NCHW

    params = dict(
        # Semantic_Head1 / Semantic_Head2: C -> C/2 -> C/2 -> C
        sh1=make_head_params(k1, C, C // 2, C // 2, C),
        sh2=make_head_params(k2, C, C // 2, C // 2, C),
        # attention branch (sigmoid gate, nclass == C): C -> C/2 -> C -> C
        att=make_head_params(k3, C, C // 2, C, C),
    )

    prep = prepare_branch_attention(params, N, C, H, W, Hy, Wy)

    fwd = jax.jit(branch_attention_forward)
    out = jax.block_until_ready(fwd(x, y, prep))
    assert out.shape == (N, C, H, W)
    assert bool(jnp.all(jnp.isfinite(out)))

    # Sanity check the fused bf16-MXU kernel against a pure-JAX f32 reference
    # (tolerance accounts for bf16 matmul operands).
    ref = jax.block_until_ready(branch_attention_reference(x, y, params))
    rel_err = (float(jnp.max(jnp.abs(out - ref)))
               / (1.0 + float(jnp.max(jnp.abs(ref)))))
    assert rel_err < 5e-2, f"kernel deviates from reference: rel_err={rel_err}"

    print("KERNEL_OK")
</pallas_src>

<mosaic_0001>
module attributes {stable_mosaic.version = 11 : i64} {
  func.func @kernel(%arg0: memref<8x512xf32, #tpu.memory_space<vmem>>, %arg1: memref<8x128xf32, #tpu.memory_space<vmem>>, %arg2: memref<64x256xbf16, #tpu.memory_space<vmem>>, %arg3: memref<9x512xf32, #tpu.memory_space<vmem>>, %arg4: memref<9x128xf32, #tpu.memory_space<vmem>>, %arg5: memref<72x144xbf16, #tpu.memory_space<vmem>>, %arg6: memref<48x1xf32, #tpu.memory_space<vmem>>, %arg7: memref<8x512xf32, #tpu.memory_space<vmem>>) attributes {dimension_semantics = [], scalar_prefetch = 0 : i64, scratch_operands = 0 : i64, tpu.core_type = #tpu.core_type<tc>} {
    %c0 = arith.constant 0 : index
    %c0_0 = arith.constant 0 : index
    %0 = vector.load %arg3[%c0, %c0_0] : memref<9x512xf32, #tpu.memory_space<vmem>>, vector<9x512xf32>
    %c0_1 = arith.constant 0 : index
    %c0_2 = arith.constant 0 : index
    %1 = vector.load %arg4[%c0_1, %c0_2] : memref<9x128xf32, #tpu.memory_space<vmem>>, vector<9x128xf32>
    %c0_3 = arith.constant 0 : index
    %c0_4 = arith.constant 0 : index
    %2 = vector.load %arg0[%c0_3, %c0_4] : memref<8x512xf32, #tpu.memory_space<vmem>>, vector<8x512xf32>
    %3 = vector.extract_strided_slice %2 {offsets = [0, 495], sizes = [8, 17], strides = [1, 1]} : vector<8x512xf32> to vector<8x17xf32>
    %4 = vector.extract_strided_slice %2 {offsets = [0, 0], sizes = [8, 495], strides = [1, 1]} : vector<8x512xf32> to vector<8x495xf32>
    %5 = tpu.concatenate %3, %4 in 1 : vector<8x17xf32>, vector<8x495xf32> -> vector<8x512xf32>
    %6 = vector.extract_strided_slice %0 {offsets = [0, 0], sizes = [1, 512], strides = [1, 1]} : vector<9x512xf32> to vector<1x512xf32>
    %7 = vector.broadcast %6 : vector<1x512xf32> to vector<8x512xf32>
    %8 = arith.mulf %5, %7 : vector<8x512xf32>
    %9 = arith.truncf %8 : vector<8x512xf32> to vector<8x512xbf16>
    %10 = vector.extract_strided_slice %2 {offsets = [0, 496], sizes = [8, 16], strides = [1, 1]} : vector<8x512xf32> to vector<8x16xf32>
    %11 = vector.extract_strided_slice %2 {offsets = [0, 0], sizes = [8, 496], strides = [1, 1]} : vector<8x512xf32> to vector<8x496xf32>
    %12 = tpu.concatenate %10, %11 in 1 : vector<8x16xf32>, vector<8x496xf32> -> vector<8x512xf32>
    %13 = vector.extract_strided_slice %0 {offsets = [1, 0], sizes = [1, 512], strides = [1, 1]} : vector<9x512xf32> to vector<1x512xf32>
    %14 = vector.broadcast %13 : vector<1x512xf32> to vector<8x512xf32>
    %15 = arith.mulf %12, %14 : vector<8x512xf32>
    %16 = arith.truncf %15 : vector<8x512xf32> to vector<8x512xbf16>
    %17 = vector.extract_strided_slice %2 {offsets = [0, 497], sizes = [8, 15], strides = [1, 1]} : vector<8x512xf32> to vector<8x15xf32>
    %18 = vector.extract_strided_slice %2 {offsets = [0, 0], sizes = [8, 497], strides = [1, 1]} : vector<8x512xf32> to vector<8x497xf32>
    %19 = tpu.concatenate %17, %18 in 1 : vector<8x15xf32>, vector<8x497xf32> -> vector<8x512xf32>
    %20 = vector.extract_strided_slice %0 {offsets = [2, 0], sizes = [1, 512], strides = [1, 1]} : vector<9x512xf32> to vector<1x512xf32>
    %21 = vector.broadcast %20 : vector<1x512xf32> to vector<8x512xf32>
    %22 = arith.mulf %19, %21 : vector<8x512xf32>
    %23 = arith.truncf %22 : vector<8x512xf32> to vector<8x512xbf16>
    %24 = vector.extract_strided_slice %2 {offsets = [0, 511], sizes = [8, 1], strides = [1, 1]} : vector<8x512xf32> to vector<8x1xf32>
    %25 = vector.extract_strided_slice %2 {offsets = [0, 0], sizes = [8, 511], strides = [1, 1]} : vector<8x512xf32> to vector<8x511xf32>
    %26 = tpu.concatenate %24, %25 in 1 : vector<8x1xf32>, vector<8x511xf32> -> vector<8x512xf32>
    %27 = vector.extract_strided_slice %0 {offsets = [3, 0], sizes = [1, 512], strides = [1, 1]} : vector<9x512xf32> to vector<1x512xf32>
    %28 = vector.broadcast %27 : vector<1x512xf32> to vector<8x512xf32>
    %29 = arith.mulf %26, %28 : vector<8x512xf32>
    %30 = arith.truncf %29 : vector<8x512xf32> to vector<8x512xbf16>
    %31 = vector.extract_strided_slice %0 {offsets = [4, 0], sizes = [1, 512], strides = [1, 1]} : vector<9x512xf32> to vector<1x512xf32>
    %32 = vector.broadcast %31 : vector<1x512xf32> to vector<8x512xf32>
    %33 = arith.mulf %2, %32 : vector<8x512xf32>
    %34 = arith.truncf %33 : vector<8x512xf32> to vector<8x512xbf16>
    %35 = vector.extract_strided_slice %2 {offsets = [0, 1], sizes = [8, 511], strides = [1, 1]} : vector<8x512xf32> to vector<8x511xf32>
    %36 = vector.extract_strided_slice %2 {offsets = [0, 0], sizes = [8, 1], strides = [1, 1]} : vector<8x512xf32> to vector<8x1xf32>
    %37 = tpu.concatenate %35, %36 in 1 : vector<8x511xf32>, vector<8x1xf32> -> vector<8x512xf32>
    %38 = vector.extract_strided_slice %0 {offsets = [5, 0], sizes = [1, 512], strides = [1, 1]} : vector<9x512xf32> to vector<1x512xf32>
    %39 = vector.broadcast %38 : vector<1x512xf32> to vector<8x512xf32>
    %40 = arith.mulf %37, %39 : vector<8x512xf32>
    %41 = arith.truncf %40 : vector<8x512xf32> to vector<8x512xbf16>
    %42 = vector.extract_strided_slice %2 {offsets = [0, 15], sizes = [8, 497], strides = [1, 1]} : vector<8x512xf32> to vector<8x497xf32>
    %43 = vector.extract_strided_slice %2 {offsets = [0, 0], sizes = [8, 15], strides = [1, 1]} : vector<8x512xf32> to vector<8x15xf32>
    %44 = tpu.concatenate %42, %43 in 1 : vector<8x497xf32>, vector<8x15xf32> -> vector<8x512xf32>
    %45 = vector.extract_strided_slice %0 {offsets = [6, 0], sizes = [1, 512], strides = [1, 1]} : vector<9x512xf32> to vector<1x512xf32>
    %46 = vector.broadcast %45 : vector<1x512xf32> to vector<8x512xf32>
    %47 = arith.mulf %44, %46 : vector<8x512xf32>
    %48 = arith.truncf %47 : vector<8x512xf32> to vector<8x512xbf16>
    %49 = vector.extract_strided_slice %2 {offsets = [0, 16], sizes = [8, 496], strides = [1, 1]} : vector<8x512xf32> to vector<8x496xf32>
    %50 = vector.extract_strided_slice %2 {offsets = [0, 0], sizes = [8, 16], strides = [1, 1]} : vector<8x512xf32> to vector<8x16xf32>
    %51 = tpu.concatenate %49, %50 in 1 : vector<8x496xf32>, vector<8x16xf32> -> vector<8x512xf32>
    %52 = vector.extract_strided_slice %0 {offsets = [7, 0], sizes = [1, 512], strides = [1, 1]} : vector<9x512xf32> to vector<1x512xf32>
    %53 = vector.broadcast %52 : vector<1x512xf32> to vector<8x512xf32>
    %54 = arith.mulf %51, %53 : vector<8x512xf32>
    %55 = arith.truncf %54 : vector<8x512xf32> to vector<8x512xbf16>
    %56 = vector.extract_strided_slice %2 {offsets = [0, 17], sizes = [8, 495], strides = [1, 1]} : vector<8x512xf32> to vector<8x495xf32>
    %57 = vector.extract_strided_slice %2 {offsets = [0, 0], sizes = [8, 17], strides = [1, 1]} : vector<8x512xf32> to vector<8x17xf32>
    %58 = tpu.concatenate %56, %57 in 1 : vector<8x495xf32>, vector<8x17xf32> -> vector<8x512xf32>
    %59 = vector.extract_strided_slice %0 {offsets = [8, 0], sizes = [1, 512], strides = [1, 1]} : vector<9x512xf32> to vector<1x512xf32>
    %60 = vector.broadcast %59 : vector<1x512xf32> to vector<8x512xf32>
    %61 = arith.mulf %58, %60 : vector<8x512xf32>
    %62 = arith.truncf %61 : vector<8x512xf32> to vector<8x512xbf16>
    %63 = tpu.concatenate %9, %16, %23, %30, %34, %41, %48, %55, %62 in 0 : vector<8x512xbf16>, vector<8x512xbf16>, vector<8x512xbf16>, vector<8x512xbf16>, vector<8x512xbf16>, vector<8x512xbf16>, vector<8x512xbf16>, vector<8x512xbf16>, vector<8x512xbf16> -> vector<72x512xbf16>
    %c0_5 = arith.constant 0 : index
    %c0_6 = arith.constant 0 : index
    %64 = vector.load %arg5[%c0_5, %c0_6] : memref<72x144xbf16, #tpu.memory_space<vmem>>, vector<16x72xbf16>
    %cst = arith.constant dense<0.000000e+00> : vector<16x512xf32>
    %65 = tpu.matmul %64, %63, %cst {dimension_numbers = #tpu.dot_dimension_numbers<[1], [0], [0], [1], [0, 0, 1, 1], [], []>} : vector<16x72xbf16>, vector<72x512xbf16>, vector<16x512xf32> -> vector<16x512xf32>
    %c0_7 = arith.constant 0 : index
    %c0_8 = arith.constant 0 : index
    %66 = vector.load %arg6[%c0_7, %c0_8] : memref<48x1xf32, #tpu.memory_space<vmem>>, vector<16x1xf32>
    %67 = vector.broadcast %66 : vector<16x1xf32> to vector<16x512xf32>
    %68 = arith.addf %65, %67 : vector<16x512xf32>
    %cst_9 = arith.constant 0.000000e+00 : f32
    %69 = vector.broadcast %cst_9 : f32 to vector<16x512xf32>
    %70 = arith.maximumf %68, %69 : vector<16x512xf32>
    %71 = vector.extract_strided_slice %70 {offsets = [0, 495], sizes = [16, 17], strides = [1, 1]} : vector<16x512xf32> to vector<16x17xf32>
    %72 = vector.extract_strided_slice %70 {offsets = [0, 0], sizes = [16, 495], strides = [1, 1]} : vector<16x512xf32> to vector<16x495xf32>
    %73 = tpu.concatenate %71, %72 in 1 : vector<16x17xf32>, vector<16x495xf32> -> vector<16x512xf32>
    %74 = vector.extract_strided_slice %0 {offsets = [0, 0], sizes = [1, 512], strides = [1, 1]} : vector<9x512xf32> to vector<1x512xf32>
    %75 = vector.broadcast %74 : vector<1x512xf32> to vector<16x512xf32>
    %76 = arith.mulf %73, %75 : vector<16x512xf32>
    %77 = arith.truncf %76 : vector<16x512xf32> to vector<16x512xbf16>
    %78 = vector.extract_strided_slice %70 {offsets = [0, 496], sizes = [16, 16], strides = [1, 1]} : vector<16x512xf32> to vector<16x16xf32>
    %79 = vector.extract_strided_slice %70 {offsets = [0, 0], sizes = [16, 496], strides = [1, 1]} : vector<16x512xf32> to vector<16x496xf32>
    %80 = tpu.concatenate %78, %79 in 1 : vector<16x16xf32>, vector<16x496xf32> -> vector<16x512xf32>
    %81 = vector.extract_strided_slice %0 {offsets = [1, 0], sizes = [1, 512], strides = [1, 1]} : vector<9x512xf32> to vector<1x512xf32>
    %82 = vector.broadcast %81 : vector<1x512xf32> to vector<16x512xf32>
    %83 = arith.mulf %80, %82 : vector<16x512xf32>
    %84 = arith.truncf %83 : vector<16x512xf32> to vector<16x512xbf16>
    %85 = vector.extract_strided_slice %70 {offsets = [0, 497], sizes = [16, 15], strides = [1, 1]} : vector<16x512xf32> to vector<16x15xf32>
    %86 = vector.extract_strided_slice %70 {offsets = [0, 0], sizes = [16, 497], strides = [1, 1]} : vector<16x512xf32> to vector<16x497xf32>
    %87 = tpu.concatenate %85, %86 in 1 : vector<16x15xf32>, vector<16x497xf32> -> vector<16x512xf32>
    %88 = vector.extract_strided_slice %0 {offsets = [2, 0], sizes = [1, 512], strides = [1, 1]} : vector<9x512xf32> to vector<1x512xf32>
    %89 = vector.broadcast %88 : vector<1x512xf32> to vector<16x512xf32>
    %90 = arith.mulf %87, %89 : vector<16x512xf32>
    %91 = arith.truncf %90 : vector<16x512xf32> to vector<16x512xbf16>
    %92 = vector.extract_strided_slice %70 {offsets = [0, 511], sizes = [16, 1], strides = [1, 1]} : vector<16x512xf32> to vector<16x1xf32>
    %93 = vector.extract_strided_slice %70 {offsets = [0, 0], sizes = [16, 511], strides = [1, 1]} : vector<16x512xf32> to vector<16x511xf32>
    %94 = tpu.concatenate %92, %93 in 1 : vector<16x1xf32>, vector<16x511xf32> -> vector<16x512xf32>
    %95 = vector.extract_strided_slice %0 {offsets = [3, 0], sizes = [1, 512], strides = [1, 1]} : vector<9x512xf32> to vector<1x512xf32>
    %96 = vector.broadcast %95 : vector<1x512xf32> to vector<16x512xf32>
    %97 = arith.mulf %94, %96 : vector<16x512xf32>
    %98 = arith.truncf %97 : vector<16x512xf32> to vector<16x512xbf16>
    %99 = vector.extract_strided_slice %0 {offsets = [4, 0], sizes = [1, 512], strides = [1, 1]} : vector<9x512xf32> to vector<1x512xf32>
    %100 = vector.broadcast %99 : vector<1x512xf32> to vector<16x512xf32>
    %101 = arith.mulf %70, %100 : vector<16x512xf32>
    %102 = arith.truncf %101 : vector<16x512xf32> to vector<16x512xbf16>
    %103 = vector.extract_strided_slice %70 {offsets = [0, 1], sizes = [16, 511], strides = [1, 1]} : vector<16x512xf32> to vector<16x511xf32>
    %104 = vector.extract_strided_slice %70 {offsets = [0, 0], sizes = [16, 1], strides = [1, 1]} : vector<16x512xf32> to vector<16x1xf32>
    %105 = tpu.concatenate %103, %104 in 1 : vector<16x511xf32>, vector<16x1xf32> -> vector<16x512xf32>
    %106 = vector.extract_strided_slice %0 {offsets = [5, 0], sizes = [1, 512], strides = [1, 1]} : vector<9x512xf32> to vector<1x512xf32>
    %107 = vector.broadcast %106 : vector<1x512xf32> to vector<16x512xf32>
    %108 = arith.mulf %105, %107 : vector<16x512xf32>
    %109 = arith.truncf %108 : vector<16x512xf32> to vector<16x512xbf16>
    %110 = vector.extract_strided_slice %70 {offsets = [0, 15], sizes = [16, 497], strides = [1, 1]} : vector<16x512xf32> to vector<16x497xf32>
    %111 = vector.extract_strided_slice %70 {offsets = [0, 0], sizes = [16, 15], strides = [1, 1]} : vector<16x512xf32> to vector<16x15xf32>
    %112 = tpu.concatenate %110, %111 in 1 : vector<16x497xf32>, vector<16x15xf32> -> vector<16x512xf32>
    %113 = vector.extract_strided_slice %0 {offsets = [6, 0], sizes = [1, 512], strides = [1, 1]} : vector<9x512xf32> to vector<1x512xf32>
    %114 = vector.broadcast %113 : vector<1x512xf32> to vector<16x512xf32>
    %115 = arith.mulf %112, %114 : vector<16x512xf32>
    %116 = arith.truncf %115 : vector<16x512xf32> to vector<16x512xbf16>
    %117 = vector.extract_strided_slice %70 {offsets = [0, 16], sizes = [16, 496], strides = [1, 1]} : vector<16x512xf32> to vector<16x496xf32>
    %118 = vector.extract_strided_slice %70 {offsets = [0, 0], sizes = [16, 16], strides = [1, 1]} : vector<16x512xf32> to vector<16x16xf32>
    %119 = tpu.concatenate %117, %118 in 1 : vector<16x496xf32>, vector<16x16xf32> -> vector<16x512xf32>
    %120 = vector.extract_strided_slice %0 {offsets = [7, 0], sizes = [1, 512], strides = [1, 1]} : vector<9x512xf32> to vector<1x512xf32>
    %121 = vector.broadcast %120 : vector<1x512xf32> to vector<16x512xf32>
    %122 = arith.mulf %119, %121 : vector<16x512xf32>
    %123 = arith.truncf %122 : vector<16x512xf32> to vector<16x512xbf16>
    %124 = vector.extract_strided_slice %70 {offsets = [0, 17], sizes = [16, 495], strides = [1, 1]} : vector<16x512xf32> to vector<16x495xf32>
    %125 = vector.extract_strided_slice %70 {offsets = [0, 0], sizes = [16, 17], strides = [1, 1]} : vector<16x512xf32> to vector<16x17xf32>
    %126 = tpu.concatenate %124, %125 in 1 : vector<16x495xf32>, vector<16x17xf32> -> vector<16x512xf32>
    %127 = vector.extract_strided_slice %0 {offsets = [8, 0], sizes = [1, 512], strides = [1, 1]} : vector<9x512xf32> to vector<1x512xf32>
    %128 = vector.broadcast %127 : vector<1x512xf32> to vector<16x512xf32>
    %129 = arith.mulf %126, %128 : vector<16x512xf32>
    %130 = arith.truncf %129 : vector<16x512xf32> to vector<16x512xbf16>
    %131 = tpu.concatenate %77, %84, %91, %98, %102, %109, %116, %123, %130 in 0 : vector<16x512xbf16>, vector<16x512xbf16>, vector<16x512xbf16>, vector<16x512xbf16>, vector<16x512xbf16>, vector<16x512xbf16>, vector<16x512xbf16>, vector<16x512xbf16>, vector<16x512xbf16> -> vector<144x512xbf16>
    %c16 = arith.constant 16 : index
    %c0_10 = arith.constant 0 : index
    %132 = vector.load %arg5[%c16, %c0_10] : memref<72x144xbf16, #tpu.memory_space<vmem>>, vector<16x144xbf16>
    %cst_11 = arith.constant dense<0.000000e+00> : vector<16x512xf32>
    %133 = tpu.matmul %132, %131, %cst_11 {dimension_numbers = #tpu.dot_dimension_numbers<[1], [0], [0], [1], [0, 0, 1, 1], [], []>} : vector<16x144xbf16>, vector<144x512xbf16>, vector<16x512xf32> -> vector<16x512xf32>
    %c16_12 = arith.constant 16 : index
    %c0_13 = arith.constant 0 : index
    %134 = vector.load %arg6[%c16_12, %c0_13] : memref<48x1xf32, #tpu.memory_space<vmem>>, vector<16x1xf32>
    %135 = vector.broadcast %134 : vector<16x1xf32> to vector<16x512xf32>
    %136 = arith.addf %133, %135 : vector<16x512xf32>
    %cst_14 = arith.constant 0.000000e+00 : f32
    %137 = vector.broadcast %cst_14 : f32 to vector<16x512xf32>
    %138 = arith.maximumf %136, %137 : vector<16x512xf32>
    %c32 = arith.constant 32 : index
    %c0_15 = arith.constant 0 : index
    %139 = vector.load %arg5[%c32, %c0_15] : memref<72x144xbf16, #tpu.memory_space<vmem>>, vector<16x16xbf16>
    %140 = arith.truncf %138 : vector<16x512xf32> to vector<16x512xbf16>
    %cst_16 = arith.constant dense<0.000000e+00> : vector<16x512xf32>
    %141 = tpu.matmul %139, %140, %cst_16 {dimension_numbers = #tpu.dot_dimension_numbers<[1], [0], [0], [1], [0, 0, 1, 1], [], []>} : vector<16x16xbf16>, vector<16x512xbf16>, vector<16x512xf32> -> vector<16x512xf32>
    %142 = vector.extract_strided_slice %141 {offsets = [0, 0], sizes = [8, 512], strides = [1, 1]} : vector<16x512xf32> to vector<8x512xf32>
    %143 = vector.extract_strided_slice %141 {offsets = [8, 0], sizes = [8, 512], strides = [1, 1]} : vector<16x512xf32> to vector<8x512xf32>
    %144 = arith.negf %143 : vector<8x512xf32>
    %145 = math.exp %144 : vector<8x512xf32>
    %cst_17 = arith.constant 1.000000e+00 : f32
    %146 = vector.broadcast %cst_17 : f32 to vector<8x512xf32>
    %147 = arith.addf %146, %145 : vector<8x512xf32>
    %148 = arith.divf %146, %147 : vector<8x512xf32>
    %c0_18 = arith.constant 0 : index
    %c0_19 = arith.constant 0 : index
    %149 = vector.load %arg1[%c0_18, %c0_19] : memref<8x128xf32, #tpu.memory_space<vmem>>, vector<8x128xf32>
    %150 = vector.extract_strided_slice %149 {offsets = [0, 119], sizes = [8, 9], strides = [1, 1]} : vector<8x128xf32> to vector<8x9xf32>
    %151 = vector.extract_strided_slice %149 {offsets = [0, 0], sizes = [8, 119], strides = [1, 1]} : vector<8x128xf32> to vector<8x119xf32>
    %152 = tpu.concatenate %150, %151 in 1 : vector<8x9xf32>, vector<8x119xf32> -> vector<8x128xf32>
    %153 = vector.extract_strided_slice %1 {offsets = [0, 0], sizes = [1, 128], strides = [1, 1]} : vector<9x128xf32> to vector<1x128xf32>
    %154 = vector.broadcast %153 : vector<1x128xf32> to vector<8x128xf32>
    %155 = arith.mulf %152, %154 : vector<8x128xf32>
    %156 = arith.truncf %155 : vector<8x128xf32> to vector<8x128xbf16>
    %157 = vector.extract_strided_slice %149 {offsets = [0, 120], sizes = [8, 8], strides = [1, 1]} : vector<8x128xf32> to vector<8x8xf32>
    %158 = vector.extract_strided_slice %149 {offsets = [0, 0], sizes = [8, 120], strides = [1, 1]} : vector<8x128xf32> to vector<8x120xf32>
    %159 = tpu.concatenate %157, %158 in 1 : vector<8x8xf32>, vector<8x120xf32> -> vector<8x128xf32>
    %160 = vector.extract_strided_slice %1 {offsets = [1, 0], sizes = [1, 128], strides = [1, 1]} : vector<9x128xf32> to vector<1x128xf32>
    %161 = vector.broadcast %160 : vector<1x128xf32> to vector<8x128xf32>
    %162 = arith.mulf %159, %161 : vector<8x128xf32>
    %163 = arith.truncf %162 : vector<8x128xf32> to vector<8x128xbf16>
    %164 = vector.extract_strided_slice %149 {offsets = [0, 121], sizes = [8, 7], strides = [1, 1]} : vector<8x128xf32> to vector<8x7xf32>
    %165 = vector.extract_strided_slice %149 {offsets = [0, 0], sizes = [8, 121], strides = [1, 1]} : vector<8x128xf32> to vector<8x121xf32>
    %166 = tpu.concatenate %164, %165 in 1 : vector<8x7xf32>, vector<8x121xf32> -> vector<8x128xf32>
    %167 = vector.extract_strided_slice %1 {offsets = [2, 0], sizes = [1, 128], strides = [1, 1]} : vector<9x128xf32> to vector<1x128xf32>
    %168 = vector.broadcast %167 : vector<1x128xf32> to vector<8x128xf32>
    %169 = arith.mulf %166, %168 : vector<8x128xf32>
    %170 = arith.truncf %169 : vector<8x128xf32> to vector<8x128xbf16>
    %171 = vector.extract_strided_slice %149 {offsets = [0, 127], sizes = [8, 1], strides = [1, 1]} : vector<8x128xf32> to vector<8x1xf32>
    %172 = vector.extract_strided_slice %149 {offsets = [0, 0], sizes = [8, 127], strides = [1, 1]} : vector<8x128xf32> to vector<8x127xf32>
    %173 = tpu.concatenate %171, %172 in 1 : vector<8x1xf32>, vector<8x127xf32> -> vector<8x128xf32>
    %174 = vector.extract_strided_slice %1 {offsets = [3, 0], sizes = [1, 128], strides = [1, 1]} : vector<9x128xf32> to vector<1x128xf32>
    %175 = vector.broadcast %174 : vector<1x128xf32> to vector<8x128xf32>
    %176 = arith.mulf %173, %175 : vector<8x128xf32>
    %177 = arith.truncf %176 : vector<8x128xf32> to vector<8x128xbf16>
    %178 = vector.extract_strided_slice %1 {offsets = [4, 0], sizes = [1, 128], strides = [1, 1]} : vector<9x128xf32> to vector<1x128xf32>
    %179 = vector.broadcast %178 : vector<1x128xf32> to vector<8x128xf32>
    %180 = arith.mulf %149, %179 : vector<8x128xf32>
    %181 = arith.truncf %180 : vector<8x128xf32> to vector<8x128xbf16>
    %182 = vector.extract_strided_slice %149 {offsets = [0, 1], sizes = [8, 127], strides = [1, 1]} : vector<8x128xf32> to vector<8x127xf32>
    %183 = vector.extract_strided_slice %149 {offsets = [0, 0], sizes = [8, 1], strides = [1, 1]} : vector<8x128xf32> to vector<8x1xf32>
    %184 = tpu.concatenate %182, %183 in 1 : vector<8x127xf32>, vector<8x1xf32> -> vector<8x128xf32>
    %185 = vector.extract_strided_slice %1 {offsets = [5, 0], sizes = [1, 128], strides = [1, 1]} : vector<9x128xf32> to vector<1x128xf32>
    %186 = vector.broadcast %185 : vector<1x128xf32> to vector<8x128xf32>
    %187 = arith.mulf %184, %186 : vector<8x128xf32>
    %188 = arith.truncf %187 : vector<8x128xf32> to vector<8x128xbf16>
    %189 = vector.extract_strided_slice %149 {offsets = [0, 7], sizes = [8, 121], strides = [1, 1]} : vector<8x128xf32> to vector<8x121xf32>
    %190 = vector.extract_strided_slice %149 {offsets = [0, 0], sizes = [8, 7], strides = [1, 1]} : vector<8x128xf32> to vector<8x7xf32>
    %191 = tpu.concatenate %189, %190 in 1 : vector<8x121xf32>, vector<8x7xf32> -> vector<8x128xf32>
    %192 = vector.extract_strided_slice %1 {offsets = [6, 0], sizes = [1, 128], strides = [1, 1]} : vector<9x128xf32> to vector<1x128xf32>
    %193 = vector.broadcast %192 : vector<1x128xf32> to vector<8x128xf32>
    %194 = arith.mulf %191, %193 : vector<8x128xf32>
    %195 = arith.truncf %194 : vector<8x128xf32> to vector<8x128xbf16>
    %196 = vector.extract_strided_slice %149 {offsets = [0, 8], sizes = [8, 120], strides = [1, 1]} : vector<8x128xf32> to vector<8x120xf32>
    %197 = vector.extract_strided_slice %149 {offsets = [0, 0], sizes = [8, 8], strides = [1, 1]} : vector<8x128xf32> to vector<8x8xf32>
    %198 = tpu.concatenate %196, %197 in 1 : vector<8x120xf32>, vector<8x8xf32> -> vector<8x128xf32>
    %199 = vector.extract_strided_slice %1 {offsets = [7, 0], sizes = [1, 128], strides = [1, 1]} : vector<9x128xf32> to vector<1x128xf32>
    %200 = vector.broadcast %199 : vector<1x128xf32> to vector<8x128xf32>
    %201 = arith.mulf %198, %200 : vector<8x128xf32>
    %202 = arith.truncf %201 : vector<8x128xf32> to vector<8x128xbf16>
    %203 = vector.extract_strided_slice %149 {offsets = [0, 9], sizes = [8, 119], strides = [1, 1]} : vector<8x128xf32> to vector<8x119xf32>
    %204 = vector.extract_strided_slice %149 {offsets = [0, 0], sizes = [8, 9], strides = [1, 1]} : vector<8x128xf32> to vector<8x9xf32>
    %205 = tpu.concatenate %203, %204 in 1 : vector<8x119xf32>, vector<8x9xf32> -> vector<8x128xf32>
    %206 = vector.extract_strided_slice %1 {offsets = [8, 0], sizes = [1, 128], strides = [1, 1]} : vector<9x128xf32> to vector<1x128xf32>
    %207 = vector.broadcast %206 : vector<1x128xf32> to vector<8x128xf32>
    %208 = arith.mulf %205, %207 : vector<8x128xf32>
    %209 = arith.truncf %208 : vector<8x128xf32> to vector<8x128xbf16>
    %210 = tpu.concatenate %156, %163, %170, %177, %181, %188, %195, %202, %209 in 0 : vector<8x128xbf16>, vector<8x128xbf16>, vector<8x128xbf16>, vector<8x128xbf16>, vector<8x128xbf16>, vector<8x128xbf16>, vector<8x128xbf16>, vector<8x128xbf16>, vector<8x128xbf16> -> vector<72x128xbf16>
    %c48 = arith.constant 48 : index
    %c0_20 = arith.constant 0 : index
    %211 = vector.load %arg5[%c48, %c0_20] : memref<72x144xbf16, #tpu.memory_space<vmem>>, vector<8x72xbf16>
    %cst_21 = arith.constant dense<0.000000e+00> : vector<8x128xf32>
    %212 = tpu.matmul %211, %210, %cst_21 {dimension_numbers = #tpu.dot_dimension_numbers<[1], [0], [0], [1], [0, 0, 1, 1], [], []>} : vector<8x72xbf16>, vector<72x128xbf16>, vector<8x128xf32> -> vector<8x128xf32>
    %c32_22 = arith.constant 32 : index
    %c0_23 = arith.constant 0 : index
    %213 = vector.load %arg6[%c32_22, %c0_23] : memref<48x1xf32, #tpu.memory_space<vmem>>, vector<8x1xf32>
    %214 = vector.broadcast %213 : vector<8x1xf32> to vector<8x128xf32>
    %215 = arith.addf %212, %214 : vector<8x128xf32>
    %cst_24 = arith.constant 0.000000e+00 : f32
    %216 = vector.broadcast %cst_24 : f32 to vector<8x128xf32>
    %217 = arith.maximumf %215, %216 : vector<8x128xf32>
    %218 = vector.extract_strided_slice %217 {offsets = [0, 119], sizes = [8, 9], strides = [1, 1]} : vector<8x128xf32> to vector<8x9xf32>
    %219 = vector.extract_strided_slice %217 {offsets = [0, 0], sizes = [8, 119], strides = [1, 1]} : vector<8x128xf32> to vector<8x119xf32>
    %220 = tpu.concatenate %218, %219 in 1 : vector<8x9xf32>, vector<8x119xf32> -> vector<8x128xf32>
    %221 = vector.extract_strided_slice %1 {offsets = [0, 0], sizes = [1, 128], strides = [1, 1]} : vector<9x128xf32> to vector<1x128xf32>
    %222 = vector.broadcast %221 : vector<1x128xf32> to vector<8x128xf32>
    %223 = arith.mulf %220, %222 : vector<8x128xf32>
    %224 = arith.truncf %223 : vector<8x128xf32> to vector<8x128xbf16>
    %225 = vector.extract_strided_slice %217 {offsets = [0, 120], sizes = [8, 8], strides = [1, 1]} : vector<8x128xf32> to vector<8x8xf32>
    %226 = vector.extract_strided_slice %217 {offsets = [0, 0], sizes = [8, 120], strides = [1, 1]} : vector<8x128xf32> to vector<8x120xf32>
    %227 = tpu.concatenate %225, %226 in 1 : vector<8x8xf32>, vector<8x120xf32> -> vector<8x128xf32>
    %228 = vector.extract_strided_slice %1 {offsets = [1, 0], sizes = [1, 128], strides = [1, 1]} : vector<9x128xf32> to vector<1x128xf32>
    %229 = vector.broadcast %228 : vector<1x128xf32> to vector<8x128xf32>
    %230 = arith.mulf %227, %229 : vector<8x128xf32>
    %231 = arith.truncf %230 : vector<8x128xf32> to vector<8x128xbf16>
    %232 = vector.extract_strided_slice %217 {offsets = [0, 121], sizes = [8, 7], strides = [1, 1]} : vector<8x128xf32> to vector<8x7xf32>
    %233 = vector.extract_strided_slice %217 {offsets = [0, 0], sizes = [8, 121], strides = [1, 1]} : vector<8x128xf32> to vector<8x121xf32>
    %234 = tpu.concatenate %232, %233 in 1 : vector<8x7xf32>, vector<8x121xf32> -> vector<8x128xf32>
    %235 = vector.extract_strided_slice %1 {offsets = [2, 0], sizes = [1, 128], strides = [1, 1]} : vector<9x128xf32> to vector<1x128xf32>
    %236 = vector.broadcast %235 : vector<1x128xf32> to vector<8x128xf32>
    %237 = arith.mulf %234, %236 : vector<8x128xf32>
    %238 = arith.truncf %237 : vector<8x128xf32> to vector<8x128xbf16>
    %239 = vector.extract_strided_slice %217 {offsets = [0, 127], sizes = [8, 1], strides = [1, 1]} : vector<8x128xf32> to vector<8x1xf32>
    %240 = vector.extract_strided_slice %217 {offsets = [0, 0], sizes = [8, 127], strides = [1, 1]} : vector<8x128xf32> to vector<8x127xf32>
    %241 = tpu.concatenate %239, %240 in 1 : vector<8x1xf32>, vector<8x127xf32> -> vector<8x128xf32>
    %242 = vector.extract_strided_slice %1 {offsets = [3, 0], sizes = [1, 128], strides = [1, 1]} : vector<9x128xf32> to vector<1x128xf32>
    %243 = vector.broadcast %242 : vector<1x128xf32> to vector<8x128xf32>
    %244 = arith.mulf %241, %243 : vector<8x128xf32>
    %245 = arith.truncf %244 : vector<8x128xf32> to vector<8x128xbf16>
    %246 = vector.extract_strided_slice %1 {offsets = [4, 0], sizes = [1, 128], strides = [1, 1]} : vector<9x128xf32> to vector<1x128xf32>
    %247 = vector.broadcast %246 : vector<1x128xf32> to vector<8x128xf32>
    %248 = arith.mulf %217, %247 : vector<8x128xf32>
    %249 = arith.truncf %248 : vector<8x128xf32> to vector<8x128xbf16>
    %250 = vector.extract_strided_slice %217 {offsets = [0, 1], sizes = [8, 127], strides = [1, 1]} : vector<8x128xf32> to vector<8x127xf32>
    %251 = vector.extract_strided_slice %217 {offsets = [0, 0], sizes = [8, 1], strides = [1, 1]} : vector<8x128xf32> to vector<8x1xf32>
    %252 = tpu.concatenate %250, %251 in 1 : vector<8x127xf32>, vector<8x1xf32> -> vector<8x128xf32>
    %253 = vector.extract_strided_slice %1 {offsets = [5, 0], sizes = [1, 128], strides = [1, 1]} : vector<9x128xf32> to vector<1x128xf32>
    %254 = vector.broadcast %253 : vector<1x128xf32> to vector<8x128xf32>
    %255 = arith.mulf %252, %254 : vector<8x128xf32>
    %256 = arith.truncf %255 : vector<8x128xf32> to vector<8x128xbf16>
    %257 = vector.extract_strided_slice %217 {offsets = [0, 7], sizes = [8, 121], strides = [1, 1]} : vector<8x128xf32> to vector<8x121xf32>
    %258 = vector.extract_strided_slice %217 {offsets = [0, 0], sizes = [8, 7], strides = [1, 1]} : vector<8x128xf32> to vector<8x7xf32>
    %259 = tpu.concatenate %257, %258 in 1 : vector<8x121xf32>, vector<8x7xf32> -> vector<8x128xf32>
    %260 = vector.extract_strided_slice %1 {offsets = [6, 0], sizes = [1, 128], strides = [1, 1]} : vector<9x128xf32> to vector<1x128xf32>
    %261 = vector.broadcast %260 : vector<1x128xf32> to vector<8x128xf32>
    %262 = arith.mulf %259, %261 : vector<8x128xf32>
    %263 = arith.truncf %262 : vector<8x128xf32> to vector<8x128xbf16>
    %264 = vector.extract_strided_slice %217 {offsets = [0, 8], sizes = [8, 120], strides = [1, 1]} : vector<8x128xf32> to vector<8x120xf32>
    %265 = vector.extract_strided_slice %217 {offsets = [0, 0], sizes = [8, 8], strides = [1, 1]} : vector<8x128xf32> to vector<8x8xf32>
    %266 = tpu.concatenate %264, %265 in 1 : vector<8x120xf32>, vector<8x8xf32> -> vector<8x128xf32>
    %267 = vector.extract_strided_slice %1 {offsets = [7, 0], sizes = [1, 128], strides = [1, 1]} : vector<9x128xf32> to vector<1x128xf32>
    %268 = vector.broadcast %267 : vector<1x128xf32> to vector<8x128xf32>
    %269 = arith.mulf %266, %268 : vector<8x128xf32>
    %270 = arith.truncf %269 : vector<8x128xf32> to vector<8x128xbf16>
    %271 = vector.extract_strided_slice %217 {offsets = [0, 9], sizes = [8, 119], strides = [1, 1]} : vector<8x128xf32> to vector<8x119xf32>
    %272 = vector.extract_strided_slice %217 {offsets = [0, 0], sizes = [8, 9], strides = [1, 1]} : vector<8x128xf32> to vector<8x9xf32>
    %273 = tpu.concatenate %271, %272 in 1 : vector<8x119xf32>, vector<8x9xf32> -> vector<8x128xf32>
    %274 = vector.extract_strided_slice %1 {offsets = [8, 0], sizes = [1, 128], strides = [1, 1]} : vector<9x128xf32> to vector<1x128xf32>
    %275 = vector.broadcast %274 : vector<1x128xf32> to vector<8x128xf32>
    %276 = arith.mulf %273, %275 : vector<8x128xf32>
    %277 = arith.truncf %276 : vector<8x128xf32> to vector<8x128xbf16>
    %278 = tpu.concatenate %224, %231, %238, %245, %249, %256, %263, %270, %277 in 0 : vector<8x128xbf16>, vector<8x128xbf16>, vector<8x128xbf16>, vector<8x128xbf16>, vector<8x128xbf16>, vector<8x128xbf16>, vector<8x128xbf16>, vector<8x128xbf16>, vector<8x128xbf16> -> vector<72x128xbf16>
    %c56 = arith.constant 56 : index
    %c0_25 = arith.constant 0 : index
    %279 = vector.load %arg5[%c56, %c0_25] : memref<72x144xbf16, #tpu.memory_space<vmem>>, vector<8x72xbf16>
    %cst_26 = arith.constant dense<0.000000e+00> : vector<8x128xf32>
    %280 = tpu.matmul %279, %278, %cst_26 {dimension_numbers = #tpu.dot_dimension_numbers<[1], [0], [0], [1], [0, 0, 1, 1], [], []>} : vector<8x72xbf16>, vector<72x128xbf16>, vector<8x128xf32> -> vector<8x128xf32>
    %c40 = arith.constant 40 : index
    %c0_27 = arith.constant 0 : index
    %281 = vector.load %arg6[%c40, %c0_27] : memref<48x1xf32, #tpu.memory_space<vmem>>, vector<8x1xf32>
    %282 = vector.broadcast %281 : vector<8x1xf32> to vector<8x128xf32>
    %283 = arith.addf %280, %282 : vector<8x128xf32>
    %cst_28 = arith.constant 0.000000e+00 : f32
    %284 = vector.broadcast %cst_28 : f32 to vector<8x128xf32>
    %285 = arith.maximumf %283, %284 : vector<8x128xf32>
    %c64 = arith.constant 64 : index
    %c0_29 = arith.constant 0 : index
    %286 = vector.load %arg5[%c64, %c0_29] : memref<72x144xbf16, #tpu.memory_space<vmem>>, vector<8x8xbf16>
    %287 = arith.truncf %285 : vector<8x128xf32> to vector<8x128xbf16>
    %cst_30 = arith.constant dense<0.000000e+00> : vector<8x128xf32>
    %288 = tpu.matmul %286, %287, %cst_30 {dimension_numbers = #tpu.dot_dimension_numbers<[1], [0], [0], [1], [0, 0, 1, 1], [], []>} : vector<8x8xbf16>, vector<8x128xbf16>, vector<8x128xf32> -> vector<8x128xf32>
    %289 = vector.extract_strided_slice %288 {offsets = [0, 0], sizes = [8, 64], strides = [1, 1]} : vector<8x128xf32> to vector<8x64xf32>
    %290 = arith.truncf %289 : vector<8x64xf32> to vector<8x64xbf16>
    %c0_31 = arith.constant 0 : index
    %c0_32 = arith.constant 0 : index
    %291 = vector.load %arg2[%c0_31, %c0_32] : memref<64x256xbf16, #tpu.memory_space<vmem>>, vector<64x256xbf16>
    %cst_33 = arith.constant dense<0.000000e+00> : vector<8x256xf32>
    %292 = tpu.matmul %290, %291, %cst_33 {dimension_numbers = #tpu.dot_dimension_numbers<[1], [0], [0], [1], [0, 0, 1, 1], [], []>} : vector<8x64xbf16>, vector<64x256xbf16>, vector<8x256xf32> -> vector<8x256xf32>
    %293 = vector.extract_strided_slice %288 {offsets = [0, 64], sizes = [8, 64], strides = [1, 1]} : vector<8x128xf32> to vector<8x64xf32>
    %294 = arith.truncf %293 : vector<8x64xf32> to vector<8x64xbf16>
    %c0_34 = arith.constant 0 : index
    %c0_35 = arith.constant 0 : index
    %295 = vector.load %arg2[%c0_34, %c0_35] : memref<64x256xbf16, #tpu.memory_space<vmem>>, vector<64x256xbf16>
    %cst_36 = arith.constant dense<0.000000e+00> : vector<8x256xf32>
    %296 = tpu.matmul %294, %295, %cst_36 {dimension_numbers = #tpu.dot_dimension_numbers<[1], [0], [0], [1], [0, 0, 1, 1], [], []>} : vector<8x64xbf16>, vector<64x256xbf16>, vector<8x256xf32> -> vector<8x256xf32>
    %297 = tpu.concatenate %292, %296 in 1 : vector<8x256xf32>, vector<8x256xf32> -> vector<8x512xf32>
    %298 = arith.mulf %142, %148 : vector<8x512xf32>
    %cst_37 = arith.constant 1.000000e+00 : f32
    %299 = vector.broadcast %cst_37 : f32 to vector<8x512xf32>
    %300 = arith.subf %299, %148 : vector<8x512xf32>
    %301 = arith.mulf %297, %300 : vector<8x512xf32>
    %302 = arith.addf %298, %301 : vector<8x512xf32>
    %c0_38 = arith.constant 0 : index
    %c0_39 = arith.constant 0 : index
    %303 = vector.load %arg7[%c0_38, %c0_39] : memref<8x512xf32, #tpu.memory_space<vmem>>, vector<8x512xf32>
    tpu.vector_store %arg7[%c0_38, %c0_39], %302 {strides = array<i32>} : memref<8x512xf32, #tpu.memory_space<vmem>>, vector<8x512xf32>,
    return
  }
}

</mosaic_0001>

<bundles_post_ra>
// kernel: branch_attention_forward.1
= control target key start
LH: loop header
LB: loop body
LE: loop exit
PB: predicated region body
PF: predicated region fallthrough
CT: control target
= control target key end

     0   :  { %s1893_s28 = smov 111   ;;  %s1894_s8 = smov 112   ;;  %v3024_v4 = vmov 0   ;;  %v63_v7 = vlaneseq  ;;  %vm371_vm0 = vcmask 908288   ;;  %vm329_vm1 = vcmask 916480   ;;  %s3016_s0 = inlined_call_operand.vmem [shape: f32[8,512], index: 0, kind: input, shape index: {}]   ;;  %s3017_s5 = inlined_call_operand.vmem [shape: bf16[72,144], index: 5, kind: input, shape index: {}]   ;;  %s3018_s6 = inlined_call_operand.vmem [shape: f32[48,1], index: 6, kind: input, shape index: {}]   ;;  %s3019_s3 = inlined_call_operand.vmem [shape: f32[9,512], index: 3, kind: input, shape index: {}]   ;;  %s3020_s1 = inlined_call_operand.vmem [shape: f32[8,128], index: 1, kind: input, shape index: {}]   ;;  %s3021_s4 = inlined_call_operand.vmem [shape: f32[9,128], index: 4, kind: input, shape index: {}]   ;;  %s3022_s2 = inlined_call_operand.vmem [shape: bf16[64,256], index: 2, kind: input, shape index: {}]   ;;  %s3023_s7 = inlined_call_operand.vmem [shape: f32[8,512], index: 7, kind: output, shape index: {}]  }
   0x1   :  { %v1954_v0 = vld [vmem:[%s3016_s0 + $0x10] sm:$0xff]  ;;  %v1959_v1 = vld [vmem:[%s3016_s0] sm:$0xff]  ;;  %v1968_v2 = vld [vmem:[%s3016_s0 + $0x8] sm:$0xff]  ;;  %s1895_s11 = smov 113   ;;  %s1896_s12 = smov 127   ;;  %569 = vmatprep.mubr.bf16.mxu0 %v3024_v4  ;;  %612 = vmatprep.mubr.bf16.mxu1 %v3024_v4  ;;  %vm437_vm2 = vcmask 1043456  }
   0x2   :  { %367 = vrot.lane.b32.xlu1 %v1954_v0, %s1893_s28  ;;  %363 = vrot.lane.b32.xlu0 %v1959_v1, %s1893_s28  ;;  %v1981_v3 = vld [vmem:[%s3016_s0 + $0x18] sm:$0xff]  ;;  %s1897_s0 = smov 1   ;;  %s1898_s13 = smov 15   ;;  %v504_v5 = vld [vmem:[%s3018_s6] sm:$0xff]  ;;  %v2045_v10 = vshrl.u32 %v63_v7, 7  ;;  %vm287_vm3 = vcmask 924672  }
   0x3   :  { %s1899_s14 = smov 16   ;;  %s1900_s15 = smov 17   ;;  %1856 = vset.pattern.permute.xlu0 %v3024_v4  ;;  %1857 = vset.pattern.permute.xlu1 %v3024_v4  ;;  %v505_v6 = vld [vmem:[%s3018_s6 + $0x8] sm:$0xff]  ;;  %v2055_v12 = vld [vmem:[%s3019_s3 + $0x20] ss:$0 sm:$0xff]  ;;  %v2101_v37 = vld [vmem:[%s3019_s3 + $0x10] sm:$0xff] }
   0x4   :  { %v2050_v11 = vld [vmem:[%s3019_s3 + $0x28] ss:$0 sm:$0xff]  ;;  %v2058_v15 = vsub.s32 7, %v2045_v10  ;;  %v2076_v26 = vld [vmem:[%s3019_s3] sm:$0xff]  ;;  %v2082_v29 = vsub.s32 6, %v2045_v10  ;;  %v2091_v32 = vsub.s32 4, %v2045_v10 }
   0x5   :  { %v2064_v17 = vld [vmem:[%s3019_s3 + $0x8] sm:$0xff]  ;;  %v1759_v30 = vld [vmem:[%s3019_s3 + $0x38] ss:$0 sm:$0xff]  ;;  %v1758_v31 = vld [vmem:[%s3019_s3 + $0x30] ss:$0 sm:$0xff]  ;;  %v2124_v47 = vsub.s32 5, %v2045_v10 }
   0x6   :  { %323 = vrot.lane.b32.xlu1 %v1968_v2, %s1894_s8  ;;  %365 = vrot.lane.b32.xlu0 %v1968_v2, %s1893_s28  ;;  %3070 = vst [vmem:[#allocation2_spill] sm:$0xff] %v2058_v15  ;;  %v2071_v22 = vrot.slane %v2064_v17, %v2058_v15  ;;  %3071 = vst [vmem:[#allocation3_spill] sm:$0xff] %v2082_v29  ;;  %v2095_v33 = vrot.slane %v2076_v26, %v2058_v15  ;;  %v2106_v38 = vld [vmem:[%s3019_s3 + $0x18] sm:$0xff]  ;;  %vm245_vm4 = vcmask 1039360   ;;  %vm180_vm5 = vcmask 7168   ;;  %s1902_s9 = smov 119  }
   0x7   :  { %3072 = vst [vmem:[#allocation4_spill] sm:$0xff] %v2091_v32  ;;  %v2113_v42 = vrot.slane %v2064_v17, %v2082_v29  ;;  %v2117_v45 = vrot.slane %v2101_v37, %v2058_v15  ;;  %v2121_v46 = vrot.slane %v2106_v38, %v2058_v15  ;;  %3074 = vst [vmem:[#allocation6_spill] sm:$0xff] %v2124_v47  ;;  %vm138_vm6 = vcmask 121856   ;;  %s1903_s10 = smov 120   ;;  %s1904_s16 = smov 121  }
   0x8   :  { %v2128_v48 = vrot.slane %v2064_v17, %v2091_v32  ;;  %v2135_v57 = vrot.slane %v2076_v26, %v2082_v29  ;;  %v2139_v58 = vrot.slane %v2101_v37, %v2082_v29  ;;  %v2147_v62 = vrot.slane %v2106_v38, %v2082_v29  ;;  %s1906_s17 = smov 8   ;;  %s1907_s18 = smov 9  }
   0x9   :  { %3073 = vst [vmem:[#allocation5_spill] sm:$0xff] %v2121_v46  ;;  %v2151_v63 = vrot.slane %v2064_v17, %v2124_v47  ;;  %vm96_vm7 = vcmask 130048   ;;  %vm54_vm8 = vcmask 138240   ;;  %vm521_vm9 = vcmask 588800   ;;  %s1910_s22 = smov 64  }
   0xa   :  { %321 = vrot.lane.b32.xlu1 %v1959_v1, %s1894_s8  ;;  %325 = vrot.lane.b32.xlu0 %v1954_v0, %s1894_s8  ;;  %3075 = vst [vmem:[#allocation7_spill] sm:$0xff] %v2139_v58  ;;  %3076 = vst [vmem:[#allocation8_spill] sm:$0xff] %v2147_v62  ;;  %vm1909_vm10 = vmmov 0   ;;  %vm1277_vm11 = vcmask 64512   ;;  %vm1640_vm12 = vcmask 523264  }
   0xe   :  { %281 = vrot.lane.b32.xlu1 %v1968_v2, %s1895_s11  ;;  %369 = vrot.lane.b32.xlu0 %v1981_v3, %s1893_s28 }
  0x12   :  { %327 = vrot.lane.b32.xlu1 %v1981_v3, %s1894_s8  ;;  %283 = vrot.lane.b32.xlu0 %v1954_v0, %s1895_s11 }
  0x16   :  { %239 = vrot.lane.b32.xlu1 %v1968_v2, %s1896_s12  ;;  %279 = vrot.lane.b32.xlu0 %v1959_v1, %s1895_s11 }
  0x1a   :  { %285 = vrot.lane.b32.xlu1 %v1981_v3, %s1895_s11  ;;  %241 = vrot.lane.b32.xlu0 %v1954_v0, %s1896_s12 }
  0x1e   :  { %243 = vrot.lane.b32.xlu1 %v1981_v3, %s1896_s12  ;;  %237 = vrot.lane.b32.xlu0 %v1959_v1, %s1896_s12 }
  0x22   :  { %176 = vrot.lane.b32.xlu1 %v1968_v2, %s1897_s0  ;;  %174 = vrot.lane.b32.xlu0 %v1959_v1, %s1897_s0 }
  0x26   :  { %132 = vrot.lane.b32.xlu1 %v1959_v1, %s1898_s13  ;;  %171 = vrot.lane.b32.xlu0 %v1981_v3, %s1897_s0 }
  0x2a   :  { %178 = vrot.lane.b32.xlu1 %v1954_v0, %s1897_s0  ;;  %134 = vrot.lane.b32.xlu0 %v1968_v2, %s1898_s13 }
  0x2e   :  { %90 = vrot.lane.b32.xlu1 %v1959_v1, %s1899_s14  ;;  %129 = vrot.lane.b32.xlu0 %v1981_v3, %s1898_s13 }
  0x32   :  { %136 = vrot.lane.b32.xlu1 %v1954_v0, %s1898_s13  ;;  %92 = vrot.lane.b32.xlu0 %v1968_v2, %s1899_s14 }
  0x36   :  { %48 = vrot.lane.b32.xlu1 %v1959_v1, %s1900_s15  ;;  %87 = vrot.lane.b32.xlu0 %v1981_v3, %s1899_s14 }
  0x3a   :  { %94 = vrot.lane.b32.xlu1 %v1954_v0, %s1899_s14  ;;  %50 = vrot.lane.b32.xlu0 %v1968_v2, %s1900_s15 }
  0x3e   :  { %52 = vrot.lane.b32.xlu1 %v1954_v0, %s1900_s15  ;;  %42 = vrot.lane.b32.xlu0 %v1981_v3, %s1900_s15 }
  0x42   :  { %508 = vperm.xlu0 %1856, %v504_v5   ;;  %513 = vperm.xlu1 %1857, %v505_v6   ;;  %v2155_v5 = vmul.f32 %v2128_v48, %v1968_v2  ;;  %v2159_v6 = vrot.slane %v2076_v26, %v2091_v32  ;;  %v2170_v2 = vrot.slane %v2076_v26, %v2124_v47 }
  0x74   :  { %v368_v8 = vpop.permute.xlu1 %367  ;;  %v364_v9 = vpop.permute.xlu0 %363 }
  0x78   :  { %v324_v13 = vpop.permute.xlu1 %323  ;;  %v366_v14 = vpop.permute.xlu0 %365 }
  0x79   :  { %v372_v16 = vsel %vm371_vm0, %v364_v9, %v366_v14  ;;  %v373_v18 = vsel %vm371_vm0, %v366_v14, %v368_v8 }
  0x7a   :  { %v398_v19 = vmul.f32 %v2050_v11, %v373_v18  ;;  %v397_v20 = vmul.f32 %v2055_v12, %v372_v16 }
  0x7c   :  { %v322_v21 = vpop.permute.xlu1 %321  ;;  %v326_v23 = vpop.permute.xlu0 %325  ;;  %v402_v24 = vpack.c.bf16 %v398_v19, %v398_v19  ;;  %v401_v25 = vpack.c.bf16 %v397_v20, %v397_v20  ;;  %v2166_v20 = vrot.slane %v2101_v37, %v2124_v47 }
  0x7d   :  { %v331_v27 = vsel %vm329_vm1, %v324_v13, %v326_v23  ;;  %v330_v39 = vsel %vm329_vm1, %v322_v21, %v324_v13 }
  0x7e   :  { %1761 = vmatprep.subr.msk.bf16.mxu0 %vm437_vm2, %v402_v24  ;;  %v526_v28 = vsel %vm437_vm2, %v401_v25, 0  ;;  %v356_v34 = vmul.f32 %v2071_v22, %v331_v27  ;;  %v355_v49 = vmul.f32 %v2095_v33, %v330_v39  ;;  %3077 = vst [vmem:[#allocation9_spill] sm:$0xff] %v2166_v20  ;;  %v2176_v24 = vrot.slane %v2106_v38, %v2124_v47 }
  0x7f   :  { %544 = vmatpush1.bf16.msra.mxu0 %v526_v28  ;;  %v2179_v25 = vsub.s32 3, %v2045_v10  ;;  %v234_v27 = vpack.c.bf16 %v2155_v5, %v2155_v5  ;;  %v229_v28 = vmul.f32 %v2159_v6, %v1959_v1 }
  0x80   :  { %v282_v35 = vpop.permute.xlu1 %281  ;;  %v370_v36 = vpop.permute.xlu0 %369  ;;  %v360_v50 = vpack.c.bf16 %v356_v34, %v356_v34  ;;  %v359_v7 = vpack.c.bf16 %v355_v49, %v355_v49  ;;  %3078 = vst [vmem:[#allocation10_spill] sm:$0xff] %v2176_v24 }
  0x81   :  { %v374_v40 = vsel %vm371_vm0, %v368_v8, %v370_v36  ;;  %v380_v41 = vsel %vm371_vm0, %v370_v36, %v364_v9  ;;  %3079 = vst [vmem:[#allocation11_spill] sm:$0xff] %v2179_v25 }
  0x82   :  { %v400_v43 = vmul.f32 %v1759_v30, %v380_v41  ;;  %v399_v44 = vmul.f32 %v1758_v31, %v374_v40  ;;  %v434_v8 = vrot.slane %v360_v50, 4  ;;  %v2187_v30 = vrot.slane %v2106_v38, %v2091_v32 }
  0x83   :  { %v2191_v31 = vrot.slane %v2101_v37, %v2091_v32  ;;  %v433_v34 = vrot.slane %v359_v7, 4 }
  0x84   :  { %v328_v51 = vpop.permute.xlu1 %327  ;;  %v284_v52 = vpop.permute.xlu0 %283  ;;  %v404_v53 = vpack.c.bf16 %v400_v43, %v400_v43  ;;  %v403_v54 = vpack.c.bf16 %v399_v44, %v399_v44  ;;  %3080 = vst [vmem:[#allocation12_spill] sm:$0xff] %v2187_v30 }
  0x85   :  { %v332_v55 = vsel %vm329_vm1, %v326_v23, %v328_v51  ;;  %v289_v56 = vsel %vm287_vm3, %v282_v35, %v284_v52  ;;  %v338_v59 = vsel %vm329_vm1, %v328_v51, %v322_v21  ;;  %3081 = vst [vmem:[#allocation13_spill] sm:$0xff] %v2191_v31 }
  0x86   :  { %v314_v60 = vmul.f32 %v2113_v42, %v289_v56  ;;  %1763 = vmatprep.subr.msk.bf16.mxu1 %vm437_vm2, %v404_v53  ;;  %v532_v61 = vsel %vm437_vm2, %v403_v54, 0  ;;  %v357_v9 = vmul.f32 %v2117_v45, %v332_v55  ;;  %v358_v18 = vmul.f32 %v2121_v46, %v338_v59 }
  0x87   :  { %587 = vmatpush1.bf16.msra.mxu1 %v532_v61  ;;  %v2202_v54 = vrot.slane %v2064_v17, %v2179_v25  ;;  %v233_v55 = vpack.c.bf16 %v229_v28, %v229_v28  ;;  %v231_v56 = vmul.f32 %v2191_v31, %v1954_v0 }
  0x88   :  { %v318_v13 = vpack.c.bf16 %v314_v60, %v314_v60  ;;  %v240_v14 = vpop.permute.xlu1 %239  ;;  %v280_v16 = vpop.permute.xlu0 %279  ;;  %v362_v41 = vpack.c.bf16 %v358_v18, %v358_v18 }
  0x89   :  { %v288_v19 = vsel %vm287_vm3, %v280_v16, %v282_v35  ;;  %v361_v35 = vpack.c.bf16 %v357_v9, %v357_v9 }
  0x8a   :  { %v313_v21 = vmul.f32 %v2135_v57, %v288_v19  ;;  %v492_v23 = vsel %vm437_vm2, %v318_v13, %v434_v8  ;;  %v436_v9 = vrot.slane %v362_v41, 4 }
  0x8b   :  { %545 = vmatprep.subr.bf16.mxu0 %v492_v23  ;;  %v435_v59 = vrot.slane %v361_v35, 4  ;;  %v235_v35 = vpack.c.bf16 %v231_v56, %v231_v56 }
  0x8c   :  { %v317_v36 = vpack.c.bf16 %v313_v21, %v313_v21  ;;  %v286_v39 = vpop.permute.xlu1 %285  ;;  %v242_v40 = vpop.permute.xlu0 %241 }
  0x8d   :  { %v290_v43 = vsel %vm287_vm3, %v284_v52, %v286_v39  ;;  %v296_v44 = vsel %vm287_vm3, %v286_v39, %v280_v16  ;;  %v247_v1 = vsel %vm245_vm4, %v240_v14, %v242_v40  ;;  %v232_v52 = vmul.f32 %v2187_v30, %v1981_v3 }
  0x8e   :  { %v315_v49 = vmul.f32 %v2139_v58, %v290_v43  ;;  %v316_v50 = vmul.f32 %v2147_v62, %v296_v44  ;;  %v272_v51 = vmul.f32 %v2151_v63, %v247_v1  ;;  %v488_v53 = vsel %vm437_vm2, %v317_v36, %v433_v34 }
  0x8f   :  { %546 = vmatpush1.bf16.msra.mxu0 %v488_v53  ;;  %v236_v34 = vpack.c.bf16 %v232_v52, %v232_v52  ;;  %v2223_v53 = vrot.slane %v2076_v26, %v2179_v25 }
  0x90   :  { %v319_v60 = vpack.c.bf16 %v315_v49, %v315_v49  ;;  %v320_v61 = vpack.c.bf16 %v316_v50, %v316_v50  ;;  %v276_v5 = vpack.c.bf16 %v272_v51, %v272_v51  ;;  %v244_v7 = vpop.permute.xlu1 %243  ;;  %v238_v8 = vpop.permute.xlu0 %237  ;;  %v2219_v51 = vsub.s32 2, %v2045_v10 }
  0x91   :  { %v248_v13 = vsel %vm245_vm4, %v242_v40, %v244_v7  ;;  %v246_v16 = vsel %vm245_vm4, %v238_v8, %v240_v14  ;;  %v254_v18 = vsel %vm245_vm4, %v244_v7, %v238_v8  ;;  %v2236_v8 = vrot.slane %v2101_v37, %v2179_v25 }
  0x92   :  { %v426_v19 = vrot.slane %v276_v5, 4  ;;  %v273_v21 = vmul.f32 %v2166_v20, %v248_v13  ;;  %v271_v3 = vmul.f32 %v2170_v2, %v246_v16  ;;  %v274_v0 = vmul.f32 %v2176_v24, %v254_v18  ;;  %3082 = vst [vmem:[#allocation14_spill] sm:$0xff] %v2219_v51 }
  0x93   :  { %v500_v23 = vsel %vm437_vm2, %v320_v61, %v436_v9  ;;  %v496_v28 = vsel %vm437_vm2, %v319_v60, %v435_v59  ;;  %v2232_v7 = vrot.slane %v2064_v17, %v2219_v51  ;;  %3083 = vst [vmem:[#allocation15_spill] sm:$0xff] %v2236_v8  ;;  %v2241_v13 = vrot.slane %v2106_v38, %v2179_v25 }
  0x94   :  { %v277_v36 = vpack.c.bf16 %v273_v21, %v273_v21  ;;  %v275_v39 = vpack.c.bf16 %v271_v3, %v271_v3  ;;  %v278_v40 = vpack.c.bf16 %v274_v0, %v274_v0  ;;  %588 = vmatprep.subr.bf16.mxu1 %v500_v23  ;;  %v177_v14 = vpop.permute.xlu1 %176  ;;  %v175_v41 = vpop.permute.xlu0 %174  ;;  %v476_v43 = vsel %vm437_vm2, %v234_v27, %v426_v19 }
  0x95   :  { %589 = vmatpush1.bf16.msra.mxu1 %v496_v28  ;;  %v181_v44 = vsel %vm180_vm5, %v175_v41, %v177_v14  ;;  %547 = vmatprep.subr.bf16.mxu0 %v476_v43  ;;  %3084 = vst [vmem:[#allocation16_spill] sm:$0xff] %v2241_v13  ;;  %v2249_v23 = vrot.slane %v2076_v26, %v2219_v51 }
  0x96   :  { %v427_v1 = vrot.slane %v277_v36, 4  ;;  %v425_v49 = vrot.slane %v275_v39, 4  ;;  %v428_v50 = vrot.slane %v278_v40, 4  ;;  %v206_v52 = vmul.f32 %v2202_v54, %v181_v44 }
  0x97   :  { %v2259_v44 = vrot.slane %v2101_v37, %v2219_v51 }
  0x98   :  { %v133_v56 = vpop.permute.xlu1 %132  ;;  %v172_v59 = vpop.permute.xlu0 %171  ;;  %v472_v27 = vsel %vm437_vm2, %v233_v55, %v425_v49  ;;  %v484_v60 = vsel %vm437_vm2, %v236_v34, %v428_v50  ;;  %v480_v61 = vsel %vm437_vm2, %v235_v35, %v427_v1  ;;  %v210_v9 = vpack.c.bf16 %v206_v52, %v206_v52 }
  0x99   :  { %v188_v5 = vsel %vm180_vm5, %v172_v59, %v175_v41  ;;  %548 = vmatpush1.bf16.msra.mxu0 %v472_v27  ;;  %590 = vmatprep.subr.bf16.mxu1 %v484_v60  ;;  %v2253_v34 = vsub.s32 1, %v2045_v10  ;;  %3086 = vst [vmem:[#allocation18_spill] sm:$0xff] %v2259_v44  ;;  %v2265_v50 = vrot.slane %v2106_v38, %v2219_v51 }
  0x9a   :  { %591 = vmatpush1.bf16.msra.mxu1 %v480_v61  ;;  %v205_v55 = vmul.f32 %v2223_v53, %v188_v5  ;;  %v418_v35 = vrot.slane %v210_v9, 4 }
  0x9b   :  { %3085 = vst [vmem:[#allocation17_spill] sm:$0xff] %v2253_v34  ;;  %3087 = vst [vmem:[#allocation19_spill] sm:$0xff] %v2265_v50 }
  0x9c   :  { %v179_v16 = vpop.permute.xlu1 %178  ;;  %v135_v18 = vpop.permute.xlu0 %134  ;;  %v209_v36 = vpack.c.bf16 %v205_v55, %v205_v55 }
  0x9d   :  { %v182_v19 = vsel %vm180_vm5, %v177_v14, %v179_v16  ;;  %v183_v21 = vsel %vm180_vm5, %v179_v16, %v172_v59  ;;  %v139_v3 = vsel %vm138_vm6, %v133_v56, %v135_v18 }
  0x9e   :  { %v164_v0 = vmul.f32 %v2232_v7, %v139_v3  ;;  %v207_v28 = vmul.f32 %v2236_v8, %v182_v19  ;;  %v208_v39 = vmul.f32 %v2241_v13, %v183_v21  ;;  %v417_v59 = vrot.slane %v209_v36, 4 }
  0xa0   :  { %v168_v40 = vpack.c.bf16 %v164_v0, %v164_v0  ;;  %v91_v14 = vpop.permute.xlu1 %90  ;;  %v130_v41 = vpop.permute.xlu0 %129  ;;  %v211_v52 = vpack.c.bf16 %v207_v28, %v207_v28  ;;  %v212_v27 = vpack.c.bf16 %v208_v39, %v208_v39  ;;  %v2278_v0 = vsub.s32 0, %v2045_v10 }
  0xa1   :  { %v146_v43 = vsel %vm138_vm6, %v130_v41, %v133_v56  ;;  %v2269_v56 = vrot.slane %v2064_v17, %v2253_v34  ;;  %v2292_v10 = vrot.slane %v2106_v38, %v2253_v34 }
  0xa2   :  { %v163_v1 = vmul.f32 %v2249_v23, %v146_v43  ;;  %v460_v49 = vsel %vm437_vm2, %v168_v40, %v418_v35  ;;  %3088 = vst [vmem:[#allocation20_spill] sm:$0xff] %v2278_v0  ;;  %v419_v28 = vrot.slane %v211_v52, 4  ;;  %v2282_v35 = vrot.slane %v2076_v26, %v2253_v34 }
  0xa3   :  { %549 = vmatprep.subr.bf16.mxu0 %v460_v49  ;;  %v2288_v49 = vrot.slane %v2101_v37, %v2253_v34  ;;  %3090 = vst [vmem:[#allocation22_spill] sm:$0xff] %v2292_v10 }
  0xa4   :  { %v167_v60 = vpack.c.bf16 %v163_v1, %v163_v1  ;;  %v137_v61 = vpop.permute.xlu1 %136  ;;  %v93_v5 = vpop.permute.xlu0 %92 }
  0xa5   :  { %v140_v9 = vsel %vm138_vm6, %v135_v18, %v137_v61  ;;  %v141_v55 = vsel %vm138_vm6, %v137_v61, %v130_v41  ;;  %v97_v16 = vsel %vm96_vm7, %v91_v14, %v93_v5  ;;  %v420_v18 = vrot.slane %v212_v27, 4  ;;  %3089 = vst [vmem:[#allocation21_spill] sm:$0xff] %v2288_v49 }
  0xa6   :  { %v165_v19 = vmul.f32 %v2259_v44, %v140_v9  ;;  %v166_v21 = vmul.f32 %v2265_v50, %v141_v55  ;;  %v456_v3 = vsel %vm437_vm2, %v167_v60, %v417_v59  ;;  %v122_v40 = vmul.f32 %v2269_v56, %v97_v16 }
  0xa7   :  { %550 = vmatpush1.bf16.msra.mxu0 %v456_v3  ;;  %v2298_v27 = vrot.slane %v2064_v17, %v2278_v0 }
  0xa8   :  { %v169_v36 = vpack.c.bf16 %v165_v19, %v165_v19  ;;  %v170_v39 = vpack.c.bf16 %v166_v21, %v166_v21  ;;  %v49_v41 = vpop.permute.xlu1 %48  ;;  %v88_v43 = vpop.permute.xlu0 %87  ;;  %v126_v60 = vpack.c.bf16 %v122_v40, %v122_v40  ;;  %v2306_v21 = vrot.slane %v2101_v37, %v2278_v0 }
  0xa9   :  { %v104_v1 = vsel %vm96_vm7, %v88_v43, %v91_v14 }
  0xaa   :  { %v468_v52 = vsel %vm437_vm2, %v170_v39, %v420_v18  ;;  %v464_v59 = vsel %vm437_vm2, %v169_v36, %v419_v28  ;;  %v121_v14 = vmul.f32 %v2282_v35, %v104_v1  ;;  %3091 = vst [vmem:[#allocation23_spill] sm:$0xff] %v2306_v21  ;;  %v2313_v18 = vrot.slane %v2076_v26, %v2278_v0 }
  0xab   :  { %592 = vmatprep.subr.bf16.mxu1 %v468_v52  ;;  %v410_v36 = vrot.slane %v126_v60, 4 }
  0xac   :  { %v95_v61 = vpop.permute.xlu1 %94  ;;  %593 = vmatpush1.bf16.msra.mxu1 %v464_v59  ;;  %v51_v9 = vpop.permute.xlu0 %50  ;;  %v125_v39 = vpack.c.bf16 %v121_v14, %v121_v14 }
  0xad   :  { %v98_v55 = vsel %vm96_vm7, %v93_v5, %v95_v61  ;;  %v99_v16 = vsel %vm96_vm7, %v95_v61, %v88_v43  ;;  %v55_v19 = vsel %vm54_vm8, %v49_v41, %v51_v9  ;;  %v2317_v5 = vrot.slane %v2106_v38, %v2278_v0  ;;  %v1369_v0 = vld [vmem:[%s3018_s6 + $0x20] sm:$0xff] }
  0xae   :  { %v123_v17 = vmul.f32 %v2288_v49, %v98_v55  ;;  %v124_v3 = vmul.f32 %v2292_v10, %v99_v16  ;;  %v80_v28 = vmul.f32 %v2298_v27, %v55_v19  ;;  %v409_v14 = vrot.slane %v125_v39, 4 }
  0xaf   :  { %3092 = vst [vmem:[#allocation24_spill] sm:$0xff] %v2317_v5 }
  0xb0   :  { %v127_v40 = vpack.c.bf16 %v123_v17, %v123_v17  ;;  %v84_v43 = vpack.c.bf16 %v80_v28, %v80_v28  ;;  %v53_v37 = vpop.permute.xlu1 %52  ;;  %v43_v1 = vpop.permute.xlu0 %42  ;;  %v128_v52 = vpack.c.bf16 %v124_v3, %v124_v3 }
  0xb1   :  { %v56_v59 = vsel %vm54_vm8, %v51_v9, %v53_v37  ;;  %v57_v61 = vsel %vm54_vm8, %v53_v37, %v43_v1  ;;  %v62_v55 = vsel %vm54_vm8, %v43_v1, %v49_v41  ;;  %v1858_v41 = vld [vmem:[%s3017_s5] ss:$8 sps:$4 sm:$0xff]  }
  0xb2   :  { %v81_v26 = vmul.f32 %v2306_v21, %v56_v59  ;;  %v79_v16 = vmul.f32 %v2313_v18, %v62_v55  ;;  %v82_v38 = vmul.f32 %v2317_v5, %v57_v61  ;;  %v444_v60 = vsel %vm437_vm2, %v84_v43, %v410_v36 }
  0xb3   :  { %v411_v19 = vrot.slane %v127_v40, 4  ;;  %551 = vmatprep.subr.bf16.mxu0 %v444_v60  ;;  %v412_v3 = vrot.slane %v128_v52, 4 }
  0xb4   :  { %v85_v17 = vpack.c.bf16 %v81_v26, %v81_v26  ;;  %v83_v28 = vpack.c.bf16 %v79_v16, %v79_v16  ;;  %v86_v4 = vpack.c.bf16 %v82_v38, %v82_v38 }
  0xb6   :  { %v440_v9 = vsel %vm437_vm2, %v83_v28, %v409_v14  ;;  %v448_v37 = vsel %vm437_vm2, %v85_v17, %v411_v19  ;;  %v452_v1 = vsel %vm437_vm2, %v86_v4, %v412_v3 }
  0xb7   :  { %552 = vmatpush1.bf16.msra.mxu0 %v440_v9  ;;  %594 = vmatprep.subr.bf16.mxu1 %v452_v1 }
  0xb8   :  { %595 = vmatpush1.bf16.msra.mxu1 %v448_v37 }
  0xba   :  { %1762 = vmatmul.mubr.msk.bf16.vlgmr.msra.gmra.mxu0 %vm521_vm9, %v1858_v41 }
  0xbb   :  { %1764 = vmatmul.mubr.msk.bf16.vlgmr.msra.gmra.mxu1 %vm521_vm9, %v1858_v41 }
  0xbd   :  { %v509_v36 = vpop.permute.xlu0 %508  ;;  %v514_v38 = vpop.permute.xlu1 %513 }
 0x17a   :  { %v571_v39 = vpop.f32.mrf.mxu0 }
 0x17b   :  { %v572_v40 = vadd.f32 %v571_v39, %v509_v36  ;;  %v614_v43 = vpop.f32.mrf.mxu1 }
 0x17c   :  { %v615_v59 = vadd.f32 %v614_v43, %v509_v36  ;;  %v573_v4 = vpop.f32.mrf.mxu0 }
 0x17d   :  { %v2334_v52 = vmax.f32 %v572_v40, 0.0  ;;  %v574_v55 = vadd.f32 %v573_v4, %v509_v36  ;;  %v616_v16 = vpop.f32.mrf.mxu1  ;;  %v1021_v4 = vld [vmem:[%s3018_s6 + $0x10] sm:$0xff] }
 0x17e   :  { %v2336_v61 = vmax.f32 %v615_v59, 0.0  ;;  %v575_v19 = vpop.f32.mrf.mxu0  ;;  %v617_v9 = vadd.f32 %v616_v16, %v509_v36  ;;  %v1859_v59 = vld [vmem:[%s3017_s5 + $0x14] ss:$8 sps:$4 sm:$0xff]   ;;  %v2460_v16 = vld [vmem:[%s3020_s1] sm:$0xff]  ;;  %s1905_s1 = smov 7  }
 0x17f   :  { %927 = vrot.lane.b32.xlu1 %v2334_v52, %s1894_s8  ;;  %v2350_v26 = vmax.f32 %v574_v55, 0.0  ;;  %v618_v60 = vpop.f32.mrf.mxu1  ;;  %v576_v17 = vadd.f32 %v575_v19, %v514_v38  ;;  %1767 = vmatprep.mubr.msk.bf16.mxu0 %vm96_vm7, %v1859_v59  ;;  %v1022_v55 = vld [vmem:[%s3018_s6 + $0x18] sm:$0xff]  ;;  %3097 = vst [vmem:[#allocation29_spill] sm:$0xff] %v2460_v16 }
 0x180   :  { %3093 = vst [vmem:[#allocation25_spill] sm:$0xff] %v2336_v61  ;;  %931 = vrot.lane.b32.xlu0 %v2336_v61, %s1894_s8  ;;  %v619_v14 = vadd.f32 %v618_v60, %v514_v38  ;;  %v2378_v37 = vmax.f32 %v617_v9, 0.0  ;;  %v577_v41 = vpop.f32.mrf.mxu0  ;;  %1768 = vmatprep.mubr.msk.bf16.mxu1 %vm96_vm7, %v1859_v59 }
 0x181   :  { %v2370_v3 = vmax.f32 %v576_v17, 0.0  ;;  %v578_v1 = vadd.f32 %v577_v41, %v514_v38  ;;  %v620_v39 = vpop.f32.mrf.mxu1 }
 0x182   :  { %v2364_v28 = vmax.f32 %v619_v14, 0.0  ;;  %3095 = vst [vmem:[#allocation27_spill] sm:$0xff] %v2378_v37  ;;  %v621_v40 = vadd.f32 %v620_v39, %v514_v38 }
 0x183   :  { %881 = vrot.lane.b32.xlu1 %v2334_v52, %s1895_s11  ;;  %v2400_v36 = vmax.f32 %v578_v1, 0.0 }
 0x184   :  { %885 = vrot.lane.b32.xlu0 %v2336_v61, %s1895_s11  ;;  %3094 = vst [vmem:[#allocation26_spill] sm:$0xff] %v2364_v28  ;;  %v2412_v43 = vmax.f32 %v621_v40, 0.0 }
 0x186   :  { %3096 = vst [vmem:[#allocation28_spill] sm:$0xff] %v2412_v43 }
 0x187   :  { %835 = vrot.lane.b32.xlu1 %v2334_v52, %s1896_s12 }
 0x188   :  { %839 = vrot.lane.b32.xlu0 %v2336_v61, %s1896_s12 }
 0x18b   :  { %783 = vrot.lane.b32.xlu1 %v2334_v52, %s1897_s0 }
 0x18c   :  { %785 = vrot.lane.b32.xlu0 %v2350_v26, %s1897_s0 }
 0x18f   :  { %737 = vrot.lane.b32.xlu1 %v2334_v52, %s1898_s13 }
 0x190   :  { %739 = vrot.lane.b32.xlu0 %v2350_v26, %s1898_s13 }
 0x193   :  { %691 = vrot.lane.b32.xlu1 %v2334_v52, %s1899_s14 }
 0x194   :  { %693 = vrot.lane.b32.xlu0 %v2350_v26, %s1899_s14 }
 0x197   :  { %929 = vrot.lane.b32.xlu1 %v2350_v26, %s1894_s8 }
 0x198   :  { %939 = vrot.lane.b32.xlu0 %v2364_v28, %s1894_s8 }
 0x19b   :  { %883 = vrot.lane.b32.xlu1 %v2350_v26, %s1895_s11 }
 0x19c   :  { %935 = vrot.lane.b32.xlu0 %v2370_v3, %s1894_s8 }
 0x19f   :  { %837 = vrot.lane.b32.xlu1 %v2350_v26, %s1896_s12 }
 0x1a0   :  { %893 = vrot.lane.b32.xlu0 %v2364_v28, %s1895_s11 }
 0x1a3   :  { %777 = vrot.lane.b32.xlu1 %v2378_v37, %s1897_s0 }
 0x1a4   :  { %889 = vrot.lane.b32.xlu0 %v2370_v3, %s1895_s11 }
 0x1a7   :  { %731 = vrot.lane.b32.xlu1 %v2378_v37, %s1898_s13 }
 0x1a8   :  { %847 = vrot.lane.b32.xlu0 %v2364_v28, %s1896_s12 }
 0x1ab   :  { %789 = vrot.lane.b32.xlu1 %v2370_v3, %s1897_s0 }
 0x1ac   :  { %843 = vrot.lane.b32.xlu0 %v2370_v3, %s1896_s12 }
 0x1af   :  { %743 = vrot.lane.b32.xlu1 %v2370_v3, %s1898_s13 }
 0x1b0   :  { %647 = vrot.lane.b32.xlu0 %v2350_v26, %s1900_s15 }
 0x1b3   :  { %697 = vrot.lane.b32.xlu1 %v2370_v3, %s1899_s14 }
 0x1b4   :  { %977 = vrot.lane.b32.xlu0 %v2336_v61, %s1893_s28 }
 0x1b7   :  { %937 = vrot.lane.b32.xlu1 %v2400_v36, %s1894_s8 }
 0x1b8   :  { %985 = vrot.lane.b32.xlu0 %v2364_v28, %s1893_s28 }
 0x1bb   :  { %891 = vrot.lane.b32.xlu1 %v2400_v36, %s1895_s11 }
 0x1bc   :  { %791 = vrot.lane.b32.xlu0 %v2400_v36, %s1897_s0 }
 0x1bf   :  { %845 = vrot.lane.b32.xlu1 %v2400_v36, %s1896_s12 }
 0x1c0   :  { %779 = vrot.lane.b32.xlu0 %v2412_v43, %s1897_s0 }
 0x1c3   :  { %685 = vrot.lane.b32.xlu1 %v2378_v37, %s1899_s14 }
 0x1c4   :  { %745 = vrot.lane.b32.xlu0 %v2400_v36, %s1898_s13 }
 0x1c7   :  { %645 = vrot.lane.b32.xlu1 %v2334_v52, %s1900_s15 }
 0x1c8   :  { %733 = vrot.lane.b32.xlu0 %v2412_v43, %s1898_s13 }
 0x1cb   :  { %651 = vrot.lane.b32.xlu1 %v2370_v3, %s1900_s15 }
 0x1cc   :  { %699 = vrot.lane.b32.xlu0 %v2400_v36, %s1899_s14 }
 0x1cf   :  { %633 = vrot.lane.b32.xlu1 %v2378_v37, %s1900_s15 }
 0x1d0   :  { %687 = vrot.lane.b32.xlu0 %v2412_v43, %s1899_s14 }
 0x1d3   :  { %975 = vrot.lane.b32.xlu1 %v2350_v26, %s1893_s28 }
 0x1d4   :  { %653 = vrot.lane.b32.xlu0 %v2400_v36, %s1900_s15 }
 0x1d7   :  { %983 = vrot.lane.b32.xlu1 %v2400_v36, %s1893_s28 }
 0x1d8   :  { %635 = vrot.lane.b32.xlu0 %v2412_v43, %s1900_s15 }
 0x1db   :  { %973 = vrot.lane.b32.xlu1 %v2334_v52, %s1893_s28 }
 0x1dc   :  { %981 = vrot.lane.b32.xlu0 %v2370_v3, %s1893_s28 }
 0x1df   :  { %1025 = vperm.xlu1 %1857, %v1021_v4  }
 0x1e0   :  { %1030 = vperm.xlu0 %1856, %v1022_v55  }
 0x1e3   :  { %1335 = vrot.lane.b32.xlu1 %v2460_v16, %s1902_s9 }
 0x1e4   :  { %1326 = vrot.lane.b32.xlu0 %v2460_v16, %s1903_s10 }
 0x1e7   :  { %1317 = vrot.lane.b32.xlu1 %v2460_v16, %s1904_s16 }
 0x1e8   :  { %1308 = vrot.lane.b32.xlu0 %v2460_v16, %s1896_s12 }
 0x1eb   :  { %1293 = vrot.lane.b32.xlu1 %v2460_v16, %s1897_s0 }
 0x1ec   :  { %1284 = vrot.lane.b32.xlu0 %v2460_v16, %s1905_s1 }
 0x1ef   :  { %1274 = vrot.lane.b32.xlu1 %v2460_v16, %s1906_s17 }
 0x1f0   :  { %1265 = vrot.lane.b32.xlu0 %v2460_v16, %s1907_s18 }
 0x1f1   :  { %v2478_v38 = vpop.permute.xlu1 %927 }
 0x1f2   :  { %v2480_v60 = vpop.permute.xlu0 %931 }
 0x1f3   :  { %933 = vrot.lane.b32.xlu1 %v2378_v37, %s1894_s8 }
 0x1f4   :  { %941 = vrot.lane.b32.xlu0 %v2412_v43, %s1894_s8 }
 0x1f5   :  { %v2486_v14 = vpop.permute.xlu1 %881 }
 0x1f6   :  { %v2488_v19 = vpop.permute.xlu0 %885 }
 0x1f7   :  { %887 = vrot.lane.b32.xlu1 %v2378_v37, %s1895_s11 }
 0x1f8   :  { %895 = vrot.lane.b32.xlu0 %v2412_v43, %s1895_s11 }
 0x1f9   :  { %v2494_v17 = vpop.permute.xlu1 %835 }
 0x1fa   :  { %v2496_v9 = vpop.permute.xlu0 %839 }
 0x1fb   :  { %841 = vrot.lane.b32.xlu1 %v2378_v37, %s1896_s12 }
 0x1fc   :  { %849 = vrot.lane.b32.xlu0 %v2412_v43, %s1896_s12 }
 0x1fd   :  { %v2502_v41 = vpop.permute.xlu1 %783 }
 0x1fe   :  { %v2504_v1 = vpop.permute.xlu0 %785 }
 0x1ff   :  { %787 = vrot.lane.b32.xlu1 %v2336_v61, %s1897_s0 }
 0x200   :  { %793 = vrot.lane.b32.xlu0 %v2364_v28, %s1897_s0 }
 0x201   :  { %v2510_v39 = vpop.permute.xlu1 %737 }
 0x202   :  { %v2512_v40 = vpop.permute.xlu0 %739 }
 0x203   :  { %741 = vrot.lane.b32.xlu1 %v2336_v61, %s1898_s13 }
 0x204   :  { %747 = vrot.lane.b32.xlu0 %v2364_v28, %s1898_s13 }
 0x205   :  { %v2518_v59 = vpop.permute.xlu1 %691 }
 0x206   :  { %v2520_v4 = vpop.permute.xlu0 %693 }
 0x207   :  { %695 = vrot.lane.b32.xlu1 %v2336_v61, %s1899_s14 }
 0x208   :  { %701 = vrot.lane.b32.xlu0 %v2364_v28, %s1899_s14 }
 0x209   :  { %v930_v55 = vpop.permute.xlu1 %929 }
 0x20a   :  { %v2526_v16 = vpop.permute.xlu0 %939 }
 0x20b   :  { %649 = vrot.lane.b32.xlu1 %v2336_v61, %s1900_s15  ;;  %v944_v61 = vsel %vm329_vm1, %v930_v55, %v2480_v60 }
 0x20c   :  { %655 = vrot.lane.b32.xlu0 %v2364_v28, %s1900_s15 }
 0x20d   :  { %v884_v32 = vpop.permute.xlu1 %883 }
 0x20e   :  { %v2532_v47 = vpop.permute.xlu0 %935  ;;  %v898_v62 = vsel %vm287_vm3, %v884_v32, %v2488_v19 }
 0x20f   :  { %3098 = vst [vmem:[#allocation30_spill] sm:$0xff] %v2532_v47  ;;  %979 = vrot.lane.b32.xlu1 %v2378_v37, %s1893_s28 }
 0x210   :  { %987 = vrot.lane.b32.xlu0 %v2412_v43, %s1893_s28  ;;  %v962_v43 = vmul.f32 %v944_v61, %v2071_v22 }
 0x211   :  { %v838_v34 = vpop.permute.xlu1 %837 }
 0x212   :  { %v2541_v51 = vpop.permute.xlu0 %893 }
 0x213   :  { %1372 = vperm.xlu1 %1857, %v1369_v0   ;;  %v943_v0 = vsel %vm329_vm1, %v2478_v38, %v930_v55  ;;  %v897_v55 = vsel %vm287_vm3, %v2486_v14, %v884_v32  ;;  %v851_v32 = vsel %vm245_vm4, %v2494_v17, %v838_v34 }
 0x214   :  { %v961_v37 = vmul.f32 %v943_v0, %v2095_v33 }
 0x215   :  { %v2543_v25 = vpop.permute.xlu1 %777 }
 0x216   :  { %v2545_v29 = vpop.permute.xlu0 %889 }
 0x219   :  { %v2547_v15 = vpop.permute.xlu1 %731 }
 0x21a   :  { %v2549_v21 = vpop.permute.xlu0 %847 }
 0x21d   :  { %v790_v5 = vpop.permute.xlu1 %789 }
 0x21e   :  { %v2551_v49 = vpop.permute.xlu0 %843 }
 0x221   :  { %v2553_v10 = vpop.permute.xlu1 %743 }
 0x222   :  { %v2555_v44 = vpop.permute.xlu0 %647 }
 0x225   :  { %v2557_v50 = vpop.permute.xlu1 %697 }
 0x226   :  { %v2559_v8 = vpop.permute.xlu0 %977 }
 0x229   :  { %v938_v13 = vpop.permute.xlu1 %937 }
 0x22a   :  { %v946_v28 = vsel %vm329_vm1, %v2532_v47, %v938_v13  ;;  %v947_v31 = vsel %vm329_vm1, %v938_v13, %v2526_v16  ;;  %v2573_v20 = vpop.permute.xlu0 %985 }
 0x22b   :  { %v965_v30 = vmul.f32 %v946_v28, %v2095_v33  ;;  %v966_v24 = vmul.f32 %v947_v31, %v2071_v22  ;;  %v915_v33 = vmul.f32 %v897_v55, %v2135_v57  ;;  %v916_v22 = vmul.f32 %v898_v62, %v2113_v42 }
 0x22d   :  { %v969_v58 = vpack.c.bf16 %v965_v30, %v961_v37  ;;  %v892_v47 = vpop.permute.xlu1 %891  ;;  %v970_v46 = vpack.c.bf16 %v966_v24, %v962_v43  ;;  %v852_v24 = vsel %vm245_vm4, %v838_v34, %v2496_v9 }
 0x22e   :  { %v900_v13 = vsel %vm287_vm3, %v2545_v29, %v892_v47  ;;  %v901_v61 = vsel %vm287_vm3, %v892_v47, %v2541_v51  ;;  %v2587_v0 = vpop.permute.xlu0 %791  ;;  %v870_v43 = vmul.f32 %v852_v24, %v2151_v63 }
 0x22f   :  { %v919_v31 = vmul.f32 %v900_v13, %v2135_v57  ;;  %v920_v28 = vmul.f32 %v901_v61, %v2113_v42  ;;  %1045 = vmatprep.subr.bf16.mxu0 %v970_v46  ;;  %v828_v42 = vmul.f32 %v2400_v36, %v2128_v48  ;;  %v869_v46 = vmul.f32 %v851_v32, %v2170_v2 }
 0x230   :  { %1046 = vmatpush1.bf16.msra.mxu0 %v969_v58  ;;  %v798_v13 = vsel %vm180_vm5, %v790_v5, %v2587_v0  ;;  %v824_v36 = vmul.f32 %v2350_v26, %v2128_v48  ;;  %v823_v26 = vmul.f32 %v2334_v52, %v2159_v6 }
 0x231   :  { %v923_v30 = vpack.c.bf16 %v919_v31, %v915_v33  ;;  %v846_v47 = vpop.permute.xlu1 %845  ;;  %v924_v37 = vpack.c.bf16 %v920_v28, %v916_v22  ;;  %v816_v31 = vmul.f32 %v798_v13, %v2202_v54 }
 0x232   :  { %v854_v62 = vsel %vm245_vm4, %v2551_v49, %v846_v47  ;;  %v855_v57 = vsel %vm245_vm4, %v846_v47, %v2549_v21  ;;  %v2603_v34 = vpop.permute.xlu0 %779  ;;  %v832_v24 = vpack.c.bf16 %v828_v42, %v824_v36  ;;  %v749_v47 = vsel %vm138_vm6, %v2510_v39, %v2512_v40 }
 0x233   :  { %v873_v55 = vmul.f32 %v854_v62, %v2170_v2  ;;  %v874_v58 = vmul.f32 %v855_v57, %v2151_v63  ;;  %1047 = vmatprep.subr.bf16.mxu0 %v924_v37  ;;  %v795_v2 = vsel %vm180_vm5, %v2502_v41, %v2504_v1  ;;  %v827_v63 = vmul.f32 %v2370_v3, %v2159_v6 }
 0x234   :  { %1048 = vmatpush1.bf16.msra.mxu0 %v923_v30  ;;  %v810_v28 = vsel %vm180_vm5, %v2603_v34, %v790_v5  ;;  %v812_v30 = vmul.f32 %v795_v2, %v2202_v54  ;;  %v809_v3 = vsel %vm180_vm5, %v2543_v25, %v2502_v41  ;;  %v766_v41 = vmul.f32 %v749_v47, %v2232_v7 }
 0x235   :  { %v877_v61 = vpack.c.bf16 %v873_v55, %v869_v46  ;;  %v2607_v33 = vpop.permute.xlu1 %685  ;;  %v878_v22 = vpack.c.bf16 %v874_v58, %v870_v43  ;;  %v815_v37 = vmul.f32 %v810_v28, %v2223_v53  ;;  %v831_v62 = vpack.c.bf16 %v827_v63, %v823_v26 }
 0x236   :  { %v2619_v32 = vpop.permute.xlu0 %745  ;;  %v820_v6 = vpack.c.bf16 %v816_v31, %v812_v30  ;;  %v811_v54 = vmul.f32 %v809_v3, %v2223_v53  ;;  %v763_v46 = vsel %vm138_vm6, %v2547_v15, %v2510_v39  ;;  %v703_v55 = vsel %vm96_vm7, %v2518_v59, %v2520_v4 }
 0x237   :  { %1049 = vmatprep.subr.bf16.mxu0 %v878_v22  ;;  %v752_v48 = vsel %vm138_vm6, %v2553_v10, %v2619_v32  ;;  %v720_v39 = vmul.f32 %v703_v55, %v2269_v56  ;;  %v717_v2 = vsel %vm96_vm7, %v2607_v33, %v2518_v59 }
 0x238   :  { %1050 = vmatpush1.bf16.msra.mxu0 %v877_v61  ;;  %v770_v57 = vmul.f32 %v752_v48, %v2232_v7  ;;  %v819_v58 = vpack.c.bf16 %v815_v37, %v811_v54 }
 0x239   :  { %1051 = vmatprep.subr.bf16.mxu0 %v832_v24  ;;  %v646_v5 = vpop.permute.xlu1 %645  ;;  %v719_v24 = vmul.f32 %v717_v2, %v2282_v35 }
 0x23a   :  { %v2635_v42 = vpop.permute.xlu0 %733  ;;  %v774_v61 = vpack.c.bf16 %v770_v57, %v766_v41  ;;  %v657_v26 = vsel %vm54_vm8, %v646_v5, %v2555_v44 }
 0x23b   :  { %v764_v52 = vsel %vm138_vm6, %v2635_v42, %v2553_v10  ;;  %v765_v10 = vmul.f32 %v763_v46, %v2249_v23  ;;  %v674_v47 = vmul.f32 %v657_v26, %v2298_v27 }
 0x23c   :  { %1052 = vmatpush1.bf16.msra.mxu0 %v831_v62  ;;  %v769_v53 = vmul.f32 %v764_v52, %v2249_v23 }
 0x23d   :  { %v652_v43 = vpop.permute.xlu1 %651  ;;  %1053 = vmatprep.subr.bf16.mxu0 %v820_v6 }
 0x23e   :  { %v2649_v13 = vpop.permute.xlu0 %699  ;;  %v773_v63 = vpack.c.bf16 %v769_v53, %v765_v10 }
 0x23f   :  { %v706_v7 = vsel %vm96_vm7, %v2557_v50, %v2649_v13 }
 0x240   :  { %1054 = vmatpush1.bf16.msra.mxu0 %v819_v58  ;;  %v724_v22 = vmul.f32 %v706_v7, %v2269_v56 }
 0x241   :  { %v2657_v36 = vpop.permute.xlu1 %633  ;;  %1055 = vmatprep.subr.bf16.mxu0 %v774_v61 }
 0x242   :  { %v2662_v31 = vpop.permute.xlu0 %687  ;;  %v728_v23 = vpack.c.bf16 %v724_v22, %v720_v39  ;;  %v3099_v22 = vmov 0  }
 0x243   :  { %v718_v28 = vsel %vm96_vm7, %v2662_v31, %v2557_v50 }
 0x244   :  { %1056 = vmatpush1.bf16.msra.mxu0 %v773_v63  ;;  %v723_v56 = vmul.f32 %v718_v28, %v2282_v35  ;;  %v671_v35 = vsel %vm54_vm8, %v2657_v36, %v646_v5 }
 0x245   :  { %v976_v48 = vpop.permute.xlu1 %975  ;;  %1057 = vmatprep.subr.bf16.mxu0 %v728_v23 }
 0x246   :  { %v727_v30 = vpack.c.bf16 %v723_v56, %v719_v24  ;;  %v2671_v59 = vpop.permute.xlu0 %653  ;;  %v990_v57 = vsel %vm371_vm0, %v976_v48, %v2559_v8 }
 0x247   :  { %v660_v3 = vsel %vm54_vm8, %v652_v43, %v2671_v59  ;;  %v1008_v55 = vmul.f32 %v2050_v11, %v990_v57 }
 0x248   :  { %v678_v50 = vmul.f32 %v660_v3, %v2298_v27  ;;  %1058 = vmatpush1.bf16.msra.mxu0 %v727_v30  ;;  %v673_v27 = vmul.f32 %v671_v35, %v2313_v18  ;;  %v3100_v35 = vld [vmem:[#allocation5_spill] sm:$0xff] }
 0x249   :  { %v984_v37 = vpop.permute.xlu1 %983 }
 0x24a   :  { %v993_v62 = vsel %vm371_vm0, %v984_v37, %v2573_v20  ;;  %v2683_v6 = vpop.permute.xlu0 %635  ;;  %v682_v54 = vpack.c.bf16 %v678_v50, %v674_v47 }
 0x24b   :  { %v1012_v52 = vmul.f32 %v2050_v11, %v993_v62  ;;  %v672_v41 = vsel %vm54_vm8, %v2683_v6, %v652_v43  ;;  %v2704_v11 = vld [vmem:[%s3017_s5 + $0x10] ss:$8 sps:$4 sm:$0xff]  }
 0x24c   :  { %v677_v46 = vmul.f32 %v672_v41, %v2313_v18  ;;  %1059 = vmatprep.subr.bf16.mxu0 %v682_v54 }
 0x24d   :  { %v2690_v5 = vpop.permute.xlu1 %973  ;;  %v1016_v7 = vpack.c.bf16 %v1012_v52, %v1008_v55  ;;  %v3101_v52 = vld [vmem:[#allocation30_spill] sm:$0xff] }
 0x24e   :  { %v989_v58 = vsel %vm371_vm0, %v2690_v5, %v976_v48  ;;  %v681_v53 = vpack.c.bf16 %v677_v46, %v673_v27  ;;  %v2696_v10 = vpop.permute.xlu0 %981 }
 0x24f   :  { %v1007_v61 = vmul.f32 %v2055_v12, %v989_v58  ;;  %v992_v43 = vsel %vm371_vm0, %v2696_v10, %v984_v37 }
 0x250   :  { %v1011_v39 = vmul.f32 %v2055_v12, %v992_v43  ;;  %1060 = vmatpush1.bf16.msra.mxu0 %v681_v53  ;;  %v3102_v53 = vld [vmem:[#allocation7_spill] sm:$0xff]  ;;  %v3103_v43 = vld [vmem:[#allocation8_spill] sm:$0xff] }
 0x251   :  { %1075 = vmatprep.subr.bf16.mxu0 %v1016_v7 }
 0x252   :  { %v1015_v18 = vpack.c.bf16 %v1011_v39, %v1007_v61 }
 0x254   :  { %1076 = vmatpush2.bf16.msra.mxu0 %v1015_v18 }
 0x257   :  { %1078 = vmatmul.mubr.bf16.vlgmr.msra.gmra.mxu0 %v2704_v11 }
 0x258   :  { %1185 = vmatprep.mubr.bf16.mxu0 %v3099_v22 }
 0x25a   :  { %v2708_v2 = vpop.permute.xlu1 %1025 }
 0x25b   :  { %v2710_v63 = vpop.permute.xlu0 %1030 }
 0x25e   :  { %v2712_v23 = vpop.permute.xlu1 %1335 }
 0x25f   :  { %v2714_v12 = vpop.permute.xlu0 %1326 }
 0x262   :  { %v2716_v28 = vpop.permute.xlu1 %1317 }
 0x263   :  { %v2718_v24 = vpop.permute.xlu0 %1308 }
 0x266   :  { %v2720_v56 = vpop.permute.xlu1 %1293 }
 0x267   :  { %v2722_v48 = vpop.permute.xlu0 %1284 }
 0x26a   :  { %v2724_v26 = vpop.permute.xlu1 %1274 }
 0x26b   :  { %v2726_v30 = vpop.permute.xlu0 %1265 }
 0x26e   :  { %v934_v3 = vpop.permute.xlu1 %933 }
 0x26f   :  { %v945_v47 = vsel %vm329_vm1, %v2480_v60, %v934_v3  ;;  %v959_v50 = vsel %vm329_vm1, %v934_v3, %v2478_v38  ;;  %v942_v57 = vpop.permute.xlu0 %941 }
 0x270   :  { %v963_v37 = vmul.f32 %v945_v47, %v2117_v45  ;;  %v964_v62 = vmul.f32 %v959_v50, %v3100_v35  ;;  %v948_v54 = vsel %vm329_vm1, %v2526_v16, %v942_v57  ;;  %v960_v41 = vsel %vm329_vm1, %v942_v57, %v3101_v52 }
 0x271   :  { %v967_v27 = vmul.f32 %v948_v54, %v2117_v45  ;;  %v968_v46 = vmul.f32 %v960_v41, %v3100_v35  ;;  %v3104_v35 = vld [vmem:[#allocation9_spill] sm:$0xff] }
 0x272   :  { %v888_v55 = vpop.permute.xlu1 %887 }
 0x273   :  { %v899_v60 = vsel %vm287_vm3, %v2488_v19, %v888_v55  ;;  %v913_v38 = vsel %vm287_vm3, %v888_v55, %v2486_v14  ;;  %v971_v58 = vpack.c.bf16 %v967_v27, %v963_v37  ;;  %v896_v16 = vpop.permute.xlu0 %895  ;;  %v972_v39 = vpack.c.bf16 %v968_v46, %v964_v62  ;;  %v3107_v55 = vld [vmem:[#allocation28_spill] sm:$0xff] }
 0x274   :  { %v917_v61 = vmul.f32 %v899_v60, %v3102_v53  ;;  %v918_v7 = vmul.f32 %v913_v38, %v3103_v43  ;;  %v902_v18 = vsel %vm287_vm3, %v2541_v51, %v896_v16  ;;  %v914_v45 = vsel %vm287_vm3, %v896_v16, %v2545_v29  ;;  %v3105_v51 = vld [vmem:[#allocation10_spill] sm:$0xff] }
 0x275   :  { %v921_v3 = vmul.f32 %v902_v18, %v3102_v53  ;;  %v922_v19 = vmul.f32 %v914_v45, %v3103_v43  ;;  %1088 = vmatprep.subr.bf16.mxu1 %v972_v39  ;;  %v3109_v39 = vld [vmem:[#allocation13_spill] sm:$0xff]  ;;  %v3110_v18 = vld [vmem:[#allocation26_spill] sm:$0xff] }
 0x276   :  { %v842_v47 = vpop.permute.xlu1 %841  ;;  %1089 = vmatpush1.bf16.msra.mxu1 %v971_v58  ;;  %v829_v45 = vmul.f32 %v3110_v18, %v3109_v39 }
 0x277   :  { %v853_v14 = vsel %vm245_vm4, %v2496_v9, %v842_v47  ;;  %v867_v50 = vsel %vm245_vm4, %v842_v47, %v2494_v17  ;;  %v925_v37 = vpack.c.bf16 %v921_v3, %v917_v61  ;;  %v850_v54 = vpop.permute.xlu0 %849  ;;  %v926_v29 = vpack.c.bf16 %v922_v19, %v918_v7  ;;  %v3106_v17 = vld [vmem:[#allocation12_spill] sm:$0xff] }
 0x278   :  { %v871_v62 = vmul.f32 %v853_v14, %v3104_v35  ;;  %v872_v57 = vmul.f32 %v867_v50, %v3105_v51  ;;  %v856_v52 = vsel %vm245_vm4, %v2549_v21, %v850_v54  ;;  %v868_v41 = vsel %vm245_vm4, %v850_v54, %v2551_v49  ;;  %v3108_v21 = vld [vmem:[#allocation27_spill] sm:$0xff]  ;;  %v3111_v3 = vld [vmem:[#allocation16_spill] sm:$0xff]  ;;  %v3112_v50 = vld [vmem:[#allocation25_spill] sm:$0xff] }
 0x279   :  { %v875_v27 = vmul.f32 %v856_v52, %v3104_v35  ;;  %v876_v9 = vmul.f32 %v868_v41, %v3105_v51  ;;  %1090 = vmatprep.subr.bf16.mxu1 %v926_v29  ;;  %v830_v60 = vmul.f32 %v3107_v55, %v3106_v17  ;;  %v826_v43 = vmul.f32 %v3108_v21, %v3106_v17  ;;  %v3114_v29 = vld [vmem:[#allocation19_spill] sm:$0xff]  ;;  %v3115_v55 = vld [vmem:[#allocation18_spill] sm:$0xff] }
 0x27a   :  { %v788_v46 = vpop.permute.xlu1 %787  ;;  %1091 = vmatpush1.bf16.msra.mxu1 %v925_v37  ;;  %v3113_v37 = vld [vmem:[#allocation15_spill] sm:$0xff] }
 0x27b   :  { %v797_v38 = vsel %vm180_vm5, %v788_v46, %v2543_v25  ;;  %v879_v58 = vpack.c.bf16 %v875_v27, %v871_v62  ;;  %v794_v53 = vpop.permute.xlu0 %793  ;;  %v880_v61 = vpack.c.bf16 %v876_v9, %v872_v57  ;;  %v796_v49 = vsel %vm180_vm5, %v2504_v1, %v788_v46 }
 0x27c   :  { %v799_v7 = vsel %vm180_vm5, %v2587_v0, %v794_v53  ;;  %v800_v16 = vsel %vm180_vm5, %v794_v53, %v2603_v34  ;;  %v814_v25 = vmul.f32 %v797_v38, %v3111_v3  ;;  %v834_v14 = vpack.c.bf16 %v830_v60, %v826_v43  ;;  %v3116_v53 = vld [vmem:[#allocation22_spill] sm:$0xff] }
 0x27d   :  { %v818_v19 = vmul.f32 %v800_v16, %v3111_v3  ;;  %1092 = vmatprep.subr.bf16.mxu1 %v880_v61  ;;  %v825_v0 = vmul.f32 %v3112_v50, %v3109_v39  ;;  %v813_v35 = vmul.f32 %v796_v49, %v3113_v37  ;;  %v817_v34 = vmul.f32 %v799_v7, %v3113_v37  ;;  %v3117_v7 = vld [vmem:[#allocation21_spill] sm:$0xff] }
 0x27e   :  { %v742_v47 = vpop.permute.xlu1 %741  ;;  %1093 = vmatpush1.bf16.msra.mxu1 %v879_v58 }
 0x27f   :  { %v751_v1 = vsel %vm138_vm6, %v742_v47, %v2547_v15  ;;  %v748_v62 = vpop.permute.xlu0 %747  ;;  %1094 = vmatprep.subr.bf16.mxu1 %v834_v14  ;;  %v750_v51 = vsel %vm138_vm6, %v2512_v40, %v742_v47  ;;  %v833_v54 = vpack.c.bf16 %v829_v45, %v825_v0  ;;  %v822_v9 = vpack.c.bf16 %v818_v19, %v814_v25  ;;  %v3118_v45 = vld [vmem:[#allocation24_spill] sm:$0xff] }
 0x280   :  { %v754_v57 = vsel %vm138_vm6, %v748_v62, %v2635_v42  ;;  %v768_v52 = vmul.f32 %v751_v1, %v3114_v29  ;;  %v753_v15 = vsel %vm138_vm6, %v2619_v32, %v748_v62  ;;  %v821_v17 = vpack.c.bf16 %v817_v34, %v813_v35  ;;  %v1891_v35 = vld [vmem:[%s3019_s3 + $0x38] ss:$0 sm:$0xff] }
 0x281   :  { %v772_v41 = vmul.f32 %v754_v57, %v3114_v29  ;;  %v767_v40 = vmul.f32 %v750_v51, %v3115_v55  ;;  %v771_v42 = vmul.f32 %v753_v15, %v3115_v55  ;;  %v3120_v15 = vld [vmem:[#allocation2_spill] sm:$0xff] }
 0x282   :  { %v696_v27 = vpop.permute.xlu1 %695  ;;  %1095 = vmatpush1.bf16.msra.mxu1 %v833_v54 }
 0x283   :  { %v705_v46 = vsel %vm96_vm7, %v696_v27, %v2607_v33  ;;  %v702_v60 = vpop.permute.xlu0 %701  ;;  %1096 = vmatprep.subr.bf16.mxu1 %v822_v9  ;;  %v704_v38 = vsel %vm96_vm7, %v2520_v4, %v696_v27  ;;  %v776_v43 = vpack.c.bf16 %v772_v41, %v768_v52  ;;  %v3121_v9 = vld [vmem:[#allocation3_spill] sm:$0xff] }
 0x284   :  { %v707_v32 = vsel %vm96_vm7, %v2649_v13, %v702_v60  ;;  %v708_v58 = vsel %vm96_vm7, %v702_v60, %v2662_v31  ;;  %v722_v61 = vmul.f32 %v705_v46, %v3116_v53  ;;  %v721_v16 = vmul.f32 %v704_v38, %v3117_v7 }
 0x285   :  { %v726_v33 = vmul.f32 %v708_v58, %v3116_v53  ;;  %v725_v4 = vmul.f32 %v707_v32, %v3117_v7  ;;  %v775_v13 = vpack.c.bf16 %v771_v42, %v767_v40  ;;  %v3122_v40 = vld [vmem:[#allocation11_spill] sm:$0xff]  ;;  %v3123_v42 = vld [vmem:[#allocation14_spill] sm:$0xff]  ;;  %v3124_v53 = vld [vmem:[#allocation17_spill] sm:$0xff] }
 0x286   :  { %v650_v21 = vpop.permute.xlu1 %649  ;;  %1097 = vmatpush1.bf16.msra.mxu1 %v821_v17 }
 0x287   :  { %v659_v49 = vsel %vm54_vm8, %v650_v21, %v2657_v36  ;;  %v656_v39 = vpop.permute.xlu0 %655  ;;  %1098 = vmatprep.subr.bf16.mxu1 %v776_v43  ;;  %v658_v31 = vsel %vm54_vm8, %v2555_v44, %v650_v21  ;;  %v730_v47 = vpack.c.bf16 %v726_v33, %v722_v61  ;;  %v729_v1 = vpack.c.bf16 %v725_v4, %v721_v16  ;;  %v3119_v44 = vld [vmem:[#allocation23_spill] sm:$0xff]  ;;  %v3125_v61 = vld [vmem:[#allocation20_spill] sm:$0xff] }
 0x288   :  { %v662_v18 = vsel %vm54_vm8, %v656_v39, %v2683_v6  ;;  %v676_v3 = vmul.f32 %v659_v49, %v3118_v45  ;;  %v661_v25 = vsel %vm54_vm8, %v2671_v59, %v656_v39  ;;  %v675_v0 = vmul.f32 %v658_v31, %v3119_v44 }
 0x289   :  { %v680_v36 = vmul.f32 %v662_v18, %v3118_v45  ;;  %v679_v6 = vmul.f32 %v661_v25, %v3119_v44 }
 0x28a   :  { %v980_v19 = vpop.permute.xlu1 %979  ;;  %1099 = vmatpush1.bf16.msra.mxu1 %v775_v13 }
 0x28b   :  { %v1005_v14 = vsel %vm371_vm0, %v980_v19, %v2690_v5  ;;  %v988_v50 = vpop.permute.xlu0 %987  ;;  %1100 = vmatprep.subr.bf16.mxu1 %v730_v47  ;;  %v991_v37 = vsel %vm371_vm0, %v2559_v8, %v980_v19  ;;  %v684_v51 = vpack.c.bf16 %v680_v36, %v676_v3  ;;  %v683_v57 = vpack.c.bf16 %v679_v6, %v675_v0  ;;  %v1892_v8 = vld [vmem:[%s3019_s3 + $0x30] ss:$0 sm:$0xff] }
 0x28c   :  { %v1006_v59 = vsel %vm371_vm0, %v988_v50, %v2696_v10  ;;  %v1010_v34 = vmul.f32 %v1891_v35, %v1005_v14  ;;  %v994_v5 = vsel %vm371_vm0, %v2573_v20, %v988_v50  ;;  %v1009_v54 = vmul.f32 %v1892_v8, %v991_v37  ;;  %v35_v20 = vld [vmem:[%s3021_s4] sm:$0xff] }
 0x28d   :  { %v1014_v62 = vmul.f32 %v1891_v35, %v1006_v59  ;;  %v1013_v29 = vmul.f32 %v1892_v8, %v994_v5  ;;  %v2839_v41 = vrot.slane %v35_v20, %v3120_v15  ;;  %v2845_v46 = vrot.slane %v35_v20, %v3121_v9  ;;  %v3126_v14 = vld [vmem:[#allocation6_spill] sm:$0xff]  ;;  %v3127_v5 = vld [vmem:[#allocation4_spill] sm:$0xff] }
 0x28e   :  { %1101 = vmatpush1.bf16.msra.mxu1 %v729_v1  ;;  %v2850_v60 = vrot.slane %v35_v20, %v3122_v40  ;;  %v2861_v33 = vrot.slane %v35_v20, %v3125_v61  ;;  %v2883_v1 = vrot.slane %v35_v20, %v3126_v14  ;;  %v1368_v15 = vld [vmem:[%s3017_s5 + $0x30] sm:$0xf] }
 0x28f   :  { %1102 = vmatprep.subr.bf16.mxu1 %v684_v51  ;;  %v1018_v10 = vpack.c.bf16 %v1014_v62, %v1010_v34  ;;  %v1017_v52 = vpack.c.bf16 %v1013_v29, %v1009_v54  ;;  %v1333_v27 = vmul.f32 %v2839_v41, %v2714_v12  ;;  %v1324_v55 = vmul.f32 %v2845_v46, %v2716_v28  ;;  %v3128_v29 = vld [vmem:[#allocation29_spill] sm:$0xff] }
 0x290   :  { %v1300_v58 = vmul.f32 %v2850_v60, %v2720_v56  ;;  %v2858_v12 = vrot.slane %v35_v20, %v3124_v53  ;;  %v1272_v56 = vmul.f32 %v2861_v33, %v2726_v30  ;;  %v1315_v35 = vmul.f32 %v2883_v1, %v2718_v24 }
 0x291   :  { %v1334_v17 = vpack.c.bf16 %v1333_v27, %v1333_v27  ;;  %v1325_v32 = vpack.c.bf16 %v1324_v55, %v1324_v55  ;;  %v2889_v62 = vrot.slane %v35_v20, %v3127_v5  ;;  %v1908_v54 = vmov 0.0  }
 0x292   :  { %1103 = vmatpush1.bf16.msra.mxu1 %v683_v57  ;;  %v1301_v21 = vpack.c.bf16 %v1300_v58, %v1300_v58  ;;  %v1282_v43 = vmul.f32 %v2858_v12, %v2724_v26  ;;  %v1273_v13 = vpack.c.bf16 %v1272_v56, %v1272_v56  ;;  %v1316_v8 = vpack.c.bf16 %v1315_v35, %v1315_v35 }
 0x293   :  { %1118 = vmatprep.subr.bf16.mxu1 %v1018_v10  ;;  %v1351_v38 = vrot.slane %v1334_v17, 4  ;;  %v1306_v24 = vmul.f32 %v2889_v62, %v3128_v29 }
 0x294   :  { %v1347_v7 = vrot.slane %v1301_v21, 4  ;;  %v1283_v4 = vpack.c.bf16 %v1282_v43, %v1282_v43  ;;  %v1349_v10 = vrot.slane %v1316_v8, 4 }
 0x295   :  { %v1366_v49 = vsel %vm437_vm2, %v1325_v32, %v1351_v38 }
 0x296   :  { %1119 = vmatpush2.bf16.msra.mxu1 %v1017_v52  ;;  %v1345_v39 = vrot.slane %v1283_v4, 4  ;;  %v1307_v52 = vpack.c.bf16 %v1306_v24, %v1306_v24 }
 0x298   :  { %v1354_v18 = vsel %vm437_vm2, %v1273_v13, %v1345_v39  ;;  %v1373_v39 = vpop.permute.xlu1 %1372 }
 0x299   :  { %1121 = vmatmul.mubr.bf16.vlgmr.msra.gmra.mxu1 %v2704_v11  ;;  %v2853_v11 = vrot.slane %v35_v20, %v3123_v42  ;;  %v1362_v20 = vsel %vm437_vm2, %v1307_v52, %v1349_v10 }
 0x29a   :  { %1228 = vmatprep.mubr.bf16.mxu1 %v3099_v22 }
 0x29b   :  { %v1291_v28 = vmul.f32 %v2853_v11, %v2722_v48  ;;  %v2875_v48 = vld [vmem:[%s3021_s4 + $0x8] ss:$0 sm:$0xff] }
 0x29c   :  { %v1342_v47 = vmul.f32 %v2875_v48, %v2712_v23  ;;  %v1862_v23 = vld [vmem:[%s3017_s5 + $0x20] ss:$8 sps:$4 sm:$0xff]  }
 0x29d   :  { %v1292_v16 = vpack.c.bf16 %v1291_v28, %v1291_v28 }
 0x29e   :  { %v1343_v59 = vpack.c.bf16 %v1342_v47, %v1342_v47 }
 0x29f   :  { %v1358_v31 = vsel %vm437_vm2, %v1292_v16, %v1347_v7 }
 0x2a0   :  { %v1379_v57 = vsel %vm437_vm2, %v1343_v59, 0 }
 0x317   :  { %v1079_v45 = vpop.f32.mrf.mxu0 }
 0x318   :  { %v1080_v30 = vadd.f32 %v1079_v45, %v2708_v2 }
 0x319   :  { %v1081_v3 = vpop.f32.mrf.mxu0 }
 0x31a   :  { %v1082_v25 = vadd.f32 %v1081_v3, %v2708_v2  ;;  %v1131_v37 = vmax.f32 %v1080_v30, 0.0 }
 0x31b   :  { %v1083_v26 = vpop.f32.mrf.mxu0 }
 0x31c   :  { %v1084_v36 = vadd.f32 %v1083_v26, %v2710_v63  ;;  %v1132_v0 = vmax.f32 %v1082_v25, 0.0 }
 0x31d   :  { %v1085_v19 = vpop.f32.mrf.mxu0 }
 0x31e   :  { %v1086_v50 = vadd.f32 %v1085_v19, %v2710_v63  ;;  %v1135_v44 = vmax.f32 %v1084_v36, 0.0 }
 0x320   :  { %v1136_v6 = vmax.f32 %v1086_v50, 0.0  ;;  %v1141_v51 = vpack.c.bf16 %v1135_v44, %v1131_v37  ;;  %v1490_v50 = vld [vmem:[%s3018_s6 + $0x28] sm:$0xff] }
 0x322   :  { %v1142_v34 = vpack.c.bf16 %v1136_v6, %v1132_v0 }
 0x324   :  { %1167 = vmatprep.subr.bf16.mxu0 %v1142_v34 }
 0x325   :  { %1168 = vmatpush1.bf16.msra.mxu0 %v1141_v51 }
 0x326   :  { %1804 = vmatprep.subr.bf16.mxu0 %v1908_v54 }
 0x328   :  { %1770 = vmatmul.mubr.msk.bf16.vlgmr.msra.gmra.mxu0 %vm96_vm7, %v1862_v23 }
 0x329   :  { %1805 = vmatpush3.bf16.msra.mxu0 %v1379_v57  ;;  %1814 = vmatprep.mubr.msk.bf16.mxu0 %vm1909_vm10, %v1908_v54 }
 0x32a   :  { %1806 = vmatprep.subr.bf16.mxu0 %v1908_v54 }
 0x32d   :  { %1807 = vmatpush3.bf16.msra.mxu0 %v1366_v49 }
 0x32e   :  { %1808 = vmatprep.subr.bf16.mxu0 %v1908_v54 }
 0x331   :  { %1809 = vmatpush3.bf16.msra.mxu0 %v1362_v20 }
 0x332   :  { %1810 = vmatprep.subr.bf16.mxu0 %v1908_v54 }
 0x335   :  { %1811 = vmatpush3.bf16.msra.mxu0 %v1358_v31 }
 0x336   :  { %1812 = vmatprep.subr.bf16.mxu0 %v1908_v54 }
 0x339   :  { %1813 = vmatpush3.bf16.msra.mxu0 %v1354_v18 }
 0x33a   :  { %1832 = vmatprep.subr.bf16.mxu0 %v1908_v54 }
 0x33c   :  { %1815 = vmatmul.mubr.msk.bf16.vlgmr.msra.gmra.mxu0 %vm521_vm9, %v1368_v15 }
 0x33d   :  { %1834 = vmatprep.mubr.msk.bf16.mxu0 %vm1909_vm10, %v1908_v54 }
 0x359   :  { %v1122_v27 = vpop.f32.mrf.mxu1 }
 0x35a   :  { %v1123_v42 = vadd.f32 %v1122_v27, %v2708_v2 }
 0x35b   :  { %v1124_v9 = vpop.f32.mrf.mxu1 }
 0x35c   :  { %v1125_v55 = vadd.f32 %v1124_v9, %v2708_v2  ;;  %v1133_v21 = vmax.f32 %v1123_v42, 0.0 }
 0x35d   :  { %v1126_v17 = vpop.f32.mrf.mxu1 }
 0x35e   :  { %v1127_v40 = vadd.f32 %v1126_v17, %v2710_v63  ;;  %v1134_v53 = vmax.f32 %v1125_v55, 0.0 }
 0x35f   :  { %v1128_v38 = vpop.f32.mrf.mxu1 }
 0x360   :  { %v1129_v32 = vadd.f32 %v1128_v38, %v2710_v63  ;;  %v1137_v58 = vmax.f32 %v1127_v40, 0.0 }
 0x362   :  { %v1138_v61 = vmax.f32 %v1129_v32, 0.0  ;;  %v1143_v43 = vpack.c.bf16 %v1137_v58, %v1133_v21  ;;  %v1865_v21 = vld [vmem:[%s3022_s2 + $0x34] ss:$8 sps:$4 sm:$0xff]  }
 0x364   :  { %v1144_v28 = vpack.c.bf16 %v1138_v61, %v1134_v53 }
 0x366   :  { %1210 = vmatprep.subr.bf16.mxu1 %v1144_v28  ;;  %v1866_v28 = vld [vmem:[%s3022_s2 + $0x20] ss:$8 sps:$4 sm:$0xff]  }
 0x367   :  { %1211 = vmatpush1.bf16.msra.mxu1 %v1143_v43  ;;  %v1871_v43 = vld [vmem:[%s3022_s2 + $0x14] ss:$8 sps:$4 sm:$0xff]  }
 0x368   :  { %1818 = vmatprep.subr.bf16.mxu1 %v1908_v54 }
 0x36a   :  { %1771 = vmatmul.mubr.msk.bf16.vlgmr.msra.gmra.mxu1 %vm96_vm7, %v1862_v23 }
 0x36b   :  { %1828 = vmatprep.mubr.msk.bf16.mxu1 %vm1909_vm10, %v1908_v54 }
 0x3e8   :  { %v1187_v49 = vpop.f32.mrf.mxu0 }
 0x3ea   :  { %v1189_v2 = vpop.f32.mrf.mxu0 }
 0x3ec   :  { %v1191_v7 = vpop.f32.mrf.mxu0 }
 0x3ed   :  { %v1772_v16 = vmul.f32 -1.442695, %v1191_v7  ;;  %v1872_v7 = vld [vmem:[%s3022_s2] ss:$8 sps:$4 sm:$0xff]  }
 0x3ee   :  { %v1193_v63 = vpop.f32.mrf.mxu0 }
 0x3ef   :  { %1875 = vpow2.f32 %v1772_v16  ;;  %v1773_v4 = vmul.f32 -1.442695, %v1193_v63 }
 0x3f1   :  { %1877 = vpow2.f32 %v1773_v4 }
 0x3fc   :  { %v1876_v56 = vpop.eup %1875  ;;  %v1415_v13 = vpop.f32.mrf.mxu0 }
 0x3fd   :  { %v1251_v31 = vadd.f32 1.0, %v1876_v56  ;;  %v1416_v18 = vadd.f32 %v1415_v13, %v1373_v39 }
 0x3fe   :  { %v1878_v45 = vpop.eup %1877  ;;  %v1816_v3 = vpop.f32.mrf.mxu0 }
 0x3ff   :  { %1879 = vrcp.f32 %v1251_v31  ;;  %v1252_v26 = vadd.f32 1.0, %v1878_v45  ;;  %v1421_v25 = vmax.f32 %v1416_v18, 0.0 }
 0x400   :  { %v1418_v36 = vpop.f32.mrf.mxu0 }
 0x401   :  { %1881 = vrcp.f32 %v1252_v26  ;;  %1455 = vrot.lane.b32.xlu1 %v1421_v25, %s1903_s10  ;;  %1460 = vrot.lane.b32.xlu0 %v1421_v25, %s1902_s9 }
 0x402   :  { %v1817_v30 = vpop.f32.mrf.mxu0 }
 0x403   :  { %v1543_v30 = vld [vmem:[%s3017_s5 + $0x40] sm:$0xf] }
 0x405   :  { %1445 = vrot.lane.b32.xlu1 %v1421_v25, %s1896_s12  ;;  %1450 = vrot.lane.b32.xlu0 %v1421_v25, %s1904_s16 }
 0x409   :  { %1433 = vrot.lane.b32.xlu1 %v1421_v25, %s1905_s1  ;;  %1438 = vrot.lane.b32.xlu0 %v1421_v25, %s1897_s0 }
 0x40c   :  { %v2927_v19 = vpop.eup %1879 }
 0x40d   :  { %1423 = vrot.lane.b32.xlu1 %v1421_v25, %s1907_s18  ;;  %1428 = vrot.lane.b32.xlu0 %v1421_v25, %s1906_s17  ;;  %v2932_v47 = vmul.f32 %v2927_v19, %v1187_v49  ;;  %v1869_v49 = vld [vmem:[%s3022_s2 + $0x10] ss:$8 sps:$4 sm:$0xff]  }
 0x40e   :  { %v2934_v14 = vpop.eup %1881 }
 0x40f   :  { %v2940_v44 = vmul.f32 %v2934_v14, %v1189_v2  ;;  %v1874_v2 = vld [vmem:[%s3022_s2 + $0x4] ss:$8 sps:$4 sm:$0xff]  }
 0x411   :  { %1493 = vperm.xlu0 %1856, %v1490_v50  }
 0x42a   :  { %v2989_v16 = vpop.f32.mrf.mxu1 }
 0x42c   :  { %v2991_v63 = vpop.f32.mrf.mxu1 }
 0x42e   :  { %v1234_v4 = vpop.f32.mrf.mxu1 }
 0x430   :  { %v1236_v56 = vpop.f32.mrf.mxu1 }
 0x473   :  { %v1456_v0 = vpop.permute.xlu1 %1455  ;;  %v1461_v6 = vpop.permute.xlu0 %1460 }
 0x474   :  { %v1458_v37 = vmul.f32 %v1456_v0, %v2839_v41  ;;  %v1463_v59 = vmul.f32 %v2875_v48, %v1461_v6  ;;  %v1443_v41 = vmul.f32 %v1421_v25, %v2889_v62 }
 0x476   :  { %v1459_v35 = vpack.c.bf16 %v1458_v37, %v1458_v37  ;;  %v1464_v34 = vpack.c.bf16 %v1463_v59, %v1463_v59 }
 0x477   :  { %v1446_v5 = vpop.permute.xlu1 %1445  ;;  %v1451_v51 = vpop.permute.xlu0 %1450 }
 0x478   :  { %v1500_v23 = vsel %vm437_vm2, %v1464_v34, 0  ;;  %v1448_v57 = vmul.f32 %v1446_v5, %v2883_v1  ;;  %v1453_v8 = vmul.f32 %v1451_v51, %v2845_v46  ;;  %v1472_v29 = vrot.slane %v1459_v35, 4 }
 0x479   :  { %1819 = vmatpush3.bf16.msra.mxu1 %v1500_v23  ;;  %v1444_v46 = vpack.c.bf16 %v1443_v41, %v1443_v41  ;;  %v1736_v34 = vsub.f32 1.0, %v2927_v19  ;;  %v1737_v51 = vsub.f32 1.0, %v2934_v14  ;;  %v1774_v19 = vmul.f32 -1.442695, %v1234_v4 }
 0x47a   :  { %v1449_v24 = vpack.c.bf16 %v1448_v57, %v1448_v57  ;;  %v1454_v10 = vpack.c.bf16 %v1453_v8, %v1453_v8  ;;  %1820 = vmatprep.subr.bf16.mxu1 %v1908_v54  ;;  %v1775_v41 = vmul.f32 -1.442695, %v1236_v56 }
 0x47b   :  { %v1434_v52 = vpop.permute.xlu1 %1433  ;;  %v1439_v48 = vpop.permute.xlu0 %1438  ;;  %1883 = vpow2.f32 %v1774_v19 }
 0x47c   :  { %v1470_v20 = vrot.slane %v1449_v24, 4  ;;  %v1441_v15 = vmul.f32 %v1439_v48, %v2850_v60  ;;  %v1487_v27 = vsel %vm437_vm2, %v1454_v10, %v1472_v29  ;;  %v1436_v1 = vmul.f32 %v1434_v52, %v2853_v11 }
 0x47d   :  { %1821 = vmatpush3.bf16.msra.mxu1 %v1487_v27  ;;  %1885 = vpow2.f32 %v1775_v41 }
 0x47e   :  { %v1442_v9 = vpack.c.bf16 %v1441_v15, %v1441_v15  ;;  %1822 = vmatprep.subr.bf16.mxu1 %v1908_v54  ;;  %v1483_v62 = vsel %vm437_vm2, %v1444_v46, %v1470_v20  ;;  %v1437_v38 = vpack.c.bf16 %v1436_v1, %v1436_v1 }
 0x47f   :  { %v1424_v17 = vpop.permute.xlu1 %1423  ;;  %v1429_v55 = vpop.permute.xlu0 %1428 }
 0x480   :  { %v1468_v40 = vrot.slane %v1442_v9, 4  ;;  %v1431_v42 = vmul.f32 %v1429_v55, %v2858_v12  ;;  %v1426_v60 = vmul.f32 %v1424_v17, %v2861_v33  ;;  %v1489_v12 = vld [vmem:[%s3017_s5 + $0x38] sm:$0xf] }
 0x481   :  { %1823 = vmatpush3.bf16.msra.mxu1 %v1483_v62  ;;  %v1863_v33 = vld [vmem:[%s3022_s2 + $0x30] ss:$8 sps:$4 sm:$0xff]  }
 0x482   :  { %v1432_v32 = vpack.c.bf16 %v1431_v42, %v1431_v42  ;;  %1824 = vmatprep.subr.bf16.mxu1 %v1908_v54  ;;  %v1479_v11 = vsel %vm437_vm2, %v1437_v38, %v1468_v40  ;;  %v1427_v53 = vpack.c.bf16 %v1426_v60, %v1426_v60 }
 0x484   :  { %v1466_v58 = vrot.slane %v1432_v32, 4 }
 0x485   :  { %1825 = vmatpush3.bf16.msra.mxu1 %v1479_v11 }
 0x486   :  { %1826 = vmatprep.subr.bf16.mxu1 %v1908_v54  ;;  %v1475_v61 = vsel %vm437_vm2, %v1427_v53, %v1466_v58  ;;  %v1868_v54 = vld [vmem:[%s3022_s2 + $0x24] ss:$8 sps:$4 sm:$0xff]  }
 0x488   :  { %v1884_v14 = vpop.eup %1883 }
 0x489   :  { %1827 = vmatpush3.bf16.msra.mxu1 %v1475_v61 }
 0x48a   :  { %1652 = vmatprep.subr.bf16.mxu1 %v1865_v21  ;;  %v1886_v52 = vpop.eup %1885 }
 0x48b   :  { %v1254_v48 = vadd.f32 1.0, %v1886_v52 }
 0x48c   :  { %1829 = vmatmul.mubr.msk.bf16.vlgmr.msra.gmra.mxu1 %vm521_vm9, %v1489_v12  ;;  %v1494_v39 = vpop.permute.xlu0 %1493 }
 0x48d   :  { %1676 = vmatprep.mubr.bf16.mxu1 %v3099_v22  ;;  %1653 = vmatpush1.bf16.msra.mxu1 %v1863_v33 }
 0x48e   :  { %1654 = vmatprep.subr.bf16.mxu1 %v1868_v54 }
 0x491   :  { %1655 = vmatpush1.bf16.msra.mxu1 %v1866_v28 }
 0x492   :  { %1656 = vmatprep.subr.bf16.mxu1 %v1871_v43 }
 0x495   :  { %1657 = vmatpush1.bf16.msra.mxu1 %v1869_v49 }
 0x496   :  { %1658 = vmatprep.subr.bf16.mxu1 %v1874_v2 }
 0x499   :  { %1659 = vmatpush1.bf16.msra.mxu1 %v1872_v7 }
 0x54c   :  { %v1536_v13 = vpop.f32.mrf.mxu1 }
 0x54d   :  { %v1537_v31 = vadd.f32 %v1536_v13, %v1494_v39 }
 0x54e   :  { %v1830_v18 = vpop.f32.mrf.mxu1 }
 0x54f   :  { %v1542_v45 = vmax.f32 %v1537_v31, 0.0 }
 0x550   :  { %v1539_v3 = vpop.f32.mrf.mxu1 }
 0x551   :  { %v1544_v26 = vpack.c.bf16 %v1542_v45, %v1542_v45 }
 0x552   :  { %v1831_v25 = vpop.f32.mrf.mxu1 }
 0x553   :  { %v1549_v36 = vsel %vm437_vm2, %v1544_v26, 0 }
 0x554   :  { %1833 = vmatpush3.bf16.msra.mxu0 %v1549_v36 }
 0x555   :  { %1699 = vmatprep.subr.bf16.mxu0 %v1865_v21 }
 0x557   :  { %1835 = vmatmul.mubr.msk.bf16.vlgmr.msra.gmra.mxu0 %vm1277_vm11, %v1543_v30 }
 0x558   :  { %1700 = vmatpush1.bf16.msra.mxu0 %v1863_v33  ;;  %1723 = vmatprep.mubr.bf16.mxu0 %v3099_v22 }
 0x559   :  { %1701 = vmatprep.subr.bf16.mxu0 %v1868_v54 }
 0x55c   :  { %1702 = vmatpush1.bf16.msra.mxu0 %v1866_v28 }
 0x55d   :  { %1703 = vmatprep.subr.bf16.mxu0 %v1871_v43 }
 0x560   :  { %1704 = vmatpush1.bf16.msra.mxu0 %v1869_v49 }
 0x561   :  { %1705 = vmatprep.subr.bf16.mxu0 %v1874_v2 }
 0x564   :  { %1706 = vmatpush1.bf16.msra.mxu0 %v1872_v7 }
 0x617   :  { %v1585_v50 = vpop.f32.mrf.mxu0 }
 0x618   :  { %v1591_v0 = vpack.c.bf16 %v1585_v50, %v1585_v50 }
 0x619   :  { %v1836_v6 = vpop.f32.mrf.mxu0 }
 0x61a   :  { %1686 = vrot.lane.b32.xlu1 %v1591_v0, %s1910_s22  ;;  %1788 = vmatmul.mubr.msk.bf16.vlgmr.msra.gmra.mxu1 %vm1640_vm12, %v1591_v0 }
 0x61b   :  { %v1588_v37 = vpop.f32.mrf.mxu0 }
 0x61d   :  { %v1837_v59 = vpop.f32.mrf.mxu0 }
 0x68c   :  { %v1687_v35 = vpop.permute.xlu1 %1686 }
 0x68d   :  { %1789 = vmatmul.mubr.msk.bf16.vlgmr.msra.gmra.mxu0 %vm1640_vm12, %v1687_v35 }
 0x6da   :  { %v1678_v22 = vpop.f32.mrf.mxu1 }
 0x6db   :  { %v1740_v5 = vmul.f32 %v1736_v34, %v1678_v22 }
 0x6dc   :  { %v1680_v23 = vpop.f32.mrf.mxu1 }
 0x6dd   :  { %v1744_v57 = vadd.f32 %v1740_v5, %v2932_v47  ;;  %v1741_v8 = vmul.f32 %v1737_v51, %v1680_v23  ;;  %v1253_v47 = vadd.f32 1.0, %v1884_v14 }
 0x6de   :  { %v1682_v29 = vpop.f32.mrf.mxu1 }
 0x6df   :  { %1748 = vst [vmem:[%s3023_s7] sm:$0xff] %v1744_v57  ;;  %v1745_v24 = vadd.f32 %v1741_v8, %v2940_v44  ;;  %1887 = vrcp.f32 %v1253_v47 }
 0x6e0   :  { %v1683_v10 = vpop.f32.mrf.mxu1  ;;  %1889 = vrcp.f32 %v1254_v48 }
 0x6e1   :  { %1749 = vst [vmem:[%s3023_s7 + $0x8] sm:$0xff] %v1745_v24 }
 0x6ec   :  { %v1888_v20 = vpop.eup %1887 }
 0x6ed   :  { %v1738_v15 = vsub.f32 1.0, %v1888_v20  ;;  %v1890_v27 = vpop.eup %1889  ;;  %v1734_v44 = vmul.f32 %v1888_v20, %v2989_v16 }
 0x6ee   :  { %v1739_v46 = vsub.f32 1.0, %v1890_v27  ;;  %v1735_v40 = vmul.f32 %v1890_v27, %v2991_v63 }
 0x74d   :  { %v1725_v1 = vpop.f32.mrf.mxu0 }
 0x74e   :  { %v1742_v9 = vmul.f32 %v1738_v15, %v1725_v1 }
 0x74f   :  { %v1727_v17 = vpop.f32.mrf.mxu0 }
 0x750   :  { %v1746_v55 = vadd.f32 %v1742_v9, %v1734_v44  ;;  %v1743_v42 = vmul.f32 %v1739_v46, %v1727_v17 }
 0x751   :  { %v1729_v62 = vpop.f32.mrf.mxu0 }
 0x752   :  { %1750 = vst [vmem:[%s3023_s7 + $0x10] sm:$0xff] %v1746_v55  ;;  %v1747_v38 = vadd.f32 %v1743_v42, %v1735_v40 }
 0x753   :  { %v1730_v60 = vpop.f32.mrf.mxu0 }
 0x754   :  { %1751 = vst [vmem:[%s3023_s7 + $0x18] sm:$0xff] %v1747_v38 }

</bundles_post_ra>
